<compile_context>
chip_gen: v7x
topology: tpu7x:2x2x1
jax: 0.10.0
libtpu: 0.0.40
codegen_flags: <defaults>
</compile_context>

<pallas_src>
from functools import lru_cache, partial

import numpy as np
import jax
import jax.numpy as jnp
from jax.experimental import pallas as pl
from jax.experimental.pallas import tpu as pltpu

C_OUT = 8                        # conv1 output channels
POOL_H, POOL_W = 8, 10           # AdaptiveAvgPool2d target
HIDDEN = 500                     # fc1 width in the PyTorch module
H_PAD = 512                      # fc1 width zero-padded to a lane multiple
IN_FEAT = C_OUT * POOL_H * POOL_W   # 640 = 5 * 128 (lane dense)
MAX_BT = 32                      # batch tile (pool matmul M = 8*32 = 256 rows)


def _adaptive_pool_matrix(in_size, out_size):
    """Row-stochastic matrix reproducing torch AdaptiveAvgPool bin boundaries."""
    m = np.zeros((out_size, in_size), np.float32)
    for i in range(out_size):
        start = (i * in_size) // out_size
        end = -((-(i + 1) * in_size) // out_size)        # ceil((i+1)*in/out)
        m[i, start:end] = 1.0 / (end - start)
    return m


@lru_cache(maxsize=None)
def _pool_consts(H, W):
    """Pool+flatten matmul constants over the zero-PADDED flattened image, cached."""
    Hq, Wq = H + 2, W + 2
    npad = Hq * Wq
    ph = _adaptive_pool_matrix(H, POOL_H)                 # (8, H)
    pw = _adaptive_pool_matrix(W, POOL_W)                 # (10, W)
    # kron[h*W+w, p*10+q] = ph[p,h] * pw[q,w]
    kron = np.einsum("ph,qw->hwpq", ph, pw).reshape(H * W, POOL_H * POOL_W)
    pool = np.zeros((npad, POOL_H * POOL_W), np.float32)  # rows at pad positions stay 0
    interior = ((np.arange(H)[:, None] + 1) * Wq
                + (np.arange(W)[None, :] + 1)).reshape(-1)
    pool[interior] = kron
    pool_tiled = np.tile(pool, (1, C_OUT))                # (npad, 640), 8x channel-tiled
    sel = np.zeros((C_OUT, IN_FEAT), np.float32)          # channel-slab selector
    for c in range(C_OUT):
        sel[c, c * POOL_H * POOL_W:(c + 1) * POOL_H * POOL_W] = 1.0
    return (jnp.asarray(pool_tiled, dtype=jnp.bfloat16),  # bf16 MXU operand
            jnp.asarray(sel))                             # f32 (VPU path)


# --------------------------- fused forward kernel ---------------------------
def _fused_kernel(xq_ref, lhs_ref, brow_ref, pool_ref, sel_ref,
                  w1_ref, b1_ref, w2_ref, b2_ref, out_ref, *, wq):
    bt, npad = xq_ref.shape                               # static block sizes

    # ---- in-kernel im2col: 9 conv taps = constant lane shifts of the padded image ----
    xq = xq_ref[...]                                      # (bt, npad) bf16
    xq2 = jnp.concatenate([xq, xq], axis=1)               # doubled for cheap static shifts
    taps = []
    for dh in range(3):
        for dw in range(3):
            o = ((dh - 1) * wq + (dw - 1)) % npad         # flat offset of this tap
            taps.append(xq2[:, o:o + npad])               # tap[:, j] = xq[:, j + off]
    patches = jnp.concatenate(taps, axis=0)               # (9*bt, npad), row = t*bt + b
    # (wrapped values only land at padding columns; pool rows there are zero)

    # ---- conv1 as ONE block-diagonal MXU matmul, then f32 bias + ReLU -------
    conv = jnp.dot(lhs_ref[...], patches,
                   preferred_element_type=jnp.float32)    # (8*bt, npad), row = b*8 + c
    act = jnp.maximum(conv + brow_ref[...], 0.0)          # f32 bias/ReLU (v5e-safe)

    # ---- AdaptiveAvgPool(8,10) + flatten as ONE matmul; channel-select reduce ----
    tiled = jnp.dot(act.astype(jnp.bfloat16), pool_ref[...],
                    preferred_element_type=jnp.float32)   # (8*bt, 640)
    feat = jnp.sum(tiled.reshape(bt, C_OUT, IN_FEAT) * sel_ref[...],
                   axis=1)                                # (bt, 640) f32, torch flatten order

    # ---- fc1 (bf16 MXU / f32 accum) + ReLU + fc2 (VPU reduce) + sigmoid -----
    h = jnp.dot(feat.astype(jnp.bfloat16), w1_ref[...],
                preferred_element_type=jnp.float32) + b1_ref[...]
    h = jnp.maximum(h, 0.0)                               # (bt, 512)
    z = jnp.sum(h * w2_ref[...], axis=-1, keepdims=True) + b2_ref[...]   # (bt, 1)
    out_ref[...] = jax.nn.sigmoid(z).T[None]              # lane-dense (1, 1, bt) row


def discriminator_forward(x, prepped):
    B, H, W = x.shape
    Hq, Wq = H + 2, W + 2
    npad = Hq * Wq

    # Batch tiling: one block for small batches, 32-sample blocks (grid >= 2 steps,
    # usable by both v7x TensorCores) for larger batches.
    if B <= MAX_BT:
        BT, B_pad = B, B
    else:
        BT = MAX_BT
        B_pad = ((B + BT - 1) // BT) * BT
    G = B_pad // BT

    # Host prep: zero-pad (conv pad=1 + batch pad) and flatten; bf16 MXU operand.
    xq = jnp.pad(x, ((0, B_pad - B), (1, 1), (1, 1)))
    xq = xq.reshape(B_pad, npad).astype(jnp.bfloat16)

    # Block-diagonal conv operand: lhs[b*8+c, t*BT+b'] = conv_w[c, t] * (b == b'),
    # plus per-row bias (row b*8+c -> conv_b[c]).
    eye = jnp.eye(BT, dtype=jnp.float32)
    lhs = jnp.einsum("ct,bp->bctp", prepped["wflat"], eye)
    lhs = lhs.reshape(BT * C_OUT, 9 * BT).astype(jnp.bfloat16)
    brow = jnp.tile(prepped["conv_b"], (BT,)).reshape(BT * C_OUT, 1)

    pool_tiled, sel = _pool_consts(H, W)

    flops = G * (2 * (C_OUT * BT) * (9 * BT) * npad          # block-diag conv
                 + 2 * (C_OUT * BT) * npad * IN_FEAT         # pool + flatten
                 + 2 * BT * IN_FEAT * H_PAD + 2 * BT * H_PAD)  # fc1 + fc2
    bytes_accessed = int(xq.size * 2 + lhs.size * 2 + pool_tiled.size * 2
                         + prepped["w1p"].size * 2
                         + (brow.size + sel.size + prepped["b1p"].size
                            + prepped["w2p"].size + 1 + B_pad) * 4)

    out = pl.pallas_call(
        partial(_fused_kernel, wq=Wq),
        out_shape=jax.ShapeDtypeStruct((G, 1, BT), jnp.float32),
        grid_spec=pl.GridSpec(
            grid=(G,),
            in_specs=[
                pl.BlockSpec((BT, npad), lambda i: (i, 0)),            # padded flat input
                pl.BlockSpec((BT * C_OUT, 9 * BT), lambda i: (0, 0)),  # block-diag conv w
                pl.BlockSpec((BT * C_OUT, 1), lambda i: (0, 0)),       # conv bias rows
                pl.BlockSpec((npad, IN_FEAT), lambda i: (0, 0)),       # pool+flatten matrix
                pl.BlockSpec((C_OUT, IN_FEAT), lambda i: (0, 0)),      # channel selector
                pl.BlockSpec((IN_FEAT, H_PAD), lambda i: (0, 0)),      # fc1 w (bf16)
                pl.BlockSpec((1, H_PAD), lambda i: (0, 0)),            # fc1 b
                pl.BlockSpec((1, H_PAD), lambda i: (0, 0)),            # fc2 w row
                pl.BlockSpec((1, 1), lambda i: (0, 0)),                # fc2 b
            ],
            out_specs=pl.BlockSpec((1, 1, BT), lambda i: (i, 0, 0)),   # lane-dense logits
        ),
        compiler_params=pltpu.CompilerParams(
            dimension_semantics=("parallel",)),
        cost_estimate=pl.CostEstimate(
            flops=flops, transcendentals=B_pad, bytes_accessed=bytes_accessed),
    )(xq, lhs, brow, pool_tiled, sel,
      prepped["w1p"], prepped["b1p"], prepped["w2p"], prepped["b2p"])

    return out.reshape(B_pad, 1)[:B]


# --------------------------- parameters -------------------------------------
def init_params(key):
    ks = jax.random.split(key, 6)

    def u(k, shape, fan_in):
        bound = 1.0 / np.sqrt(fan_in)
        return jax.random.uniform(k, shape, jnp.float32, -bound, bound)

    return dict(
        conv_w=u(ks[0], (C_OUT, 1, 3, 3), 9),       # Conv2d(1, 8, 3)
        conv_b=u(ks[1], (C_OUT,), 9),
        # NOTE: stored (in, out); real PyTorch Linear weights (out, in) must be transposed.
        w1=u(ks[2], (IN_FEAT, HIDDEN), IN_FEAT),    # Linear(640, 500)
        b1=u(ks[3], (1, HIDDEN), IN_FEAT),
        w2=u(ks[4], (HIDDEN, 1), HIDDEN),           # Linear(500, 1)
        b2=u(ks[5], (1, 1), HIDDEN),
    )


def prepare_params(params):
    """One-time packing of parameters into kernel-friendly, lane-aligned forms."""
    wflat = params["conv_w"].reshape(C_OUT, 9).astype(jnp.float32)   # taps dh*3+dw
    w1p = (jnp.zeros((IN_FEAT, H_PAD), jnp.float32)
           .at[:, :HIDDEN].set(params["w1"]).astype(jnp.bfloat16))   # bf16 MXU operand
    b1p = jnp.zeros((1, H_PAD), jnp.float32).at[:, :HIDDEN].set(params["b1"])
    w2p = (jnp.zeros((1, H_PAD), jnp.float32)
           .at[:, :HIDDEN].set(params["w2"].reshape(1, HIDDEN)))
    b2p = params["b2"].reshape(1, 1)
    return dict(wflat=wflat, conv_b=params["conv_b"].astype(jnp.float32),
                w1p=w1p, b1p=b1p, w2p=w2p, b2p=b2p)


# --------------------------- pure-JAX reference (for validation) ------------
def _reference_forward(x, params):
    B, H, W = x.shape
    xp = jnp.pad(x, ((0, 0), (1, 1), (1, 1)))
    wf = params["conv_w"].reshape(C_OUT, 3, 3)
    conv = jnp.zeros((B, C_OUT, H, W), jnp.float32)
    for dh in range(3):
        for dw in range(3):
            conv = conv + wf[:, dh, dw][None, :, None, None] * xp[:, None, dh:dh + H, dw:dw + W]
    act = jnp.maximum(conv + params["conv_b"][None, :, None, None], 0.0)
    ph = jnp.asarray(_adaptive_pool_matrix(H, POOL_H))
    pw = jnp.asarray(_adaptive_pool_matrix(W, POOL_W))
    pooled = jnp.einsum("ph,qw,bchw->bcpq", ph, pw, act)
    feat = pooled.reshape(B, IN_FEAT)
    h = jnp.maximum(feat @ params["w1"] + params["b1"], 0.0)
    return jax.nn.sigmoid(h @ params["w2"] + params["b2"])


if __name__ == "__main__":
    key = jax.random.PRNGKey(0)
    pkey, xkey = jax.random.split(key)
    params = init_params(pkey)
    prepped = prepare_params(params)

    # Small shapes consistent with the module: batch=2, spectrogram 16 x 20.
    B, H, W = 2, 16, 20
    x = jax.random.normal(xkey, (B, H, W), jnp.float32)

    out = discriminator_forward(x, prepped)
    out = jax.block_until_ready(out)
    assert out.shape == (B, 1) and out.dtype == jnp.float32

    ref = jax.block_until_ready(_reference_forward(x, params))
    np.testing.assert_allclose(np.asarray(out), np.asarray(ref), atol=2e-2, rtol=2e-2)

    print("KERNEL_OK")
</pallas_src>

<mosaic_0001>
module attributes {stable_mosaic.version = 11 : i64} {
  func.func @_fused_kernel(%arg0: i32, %arg1: memref<2x396xbf16, #tpu.memory_space<vmem>>, %arg2: memref<16x18xbf16, #tpu.memory_space<vmem>>, %arg3: memref<16x1xf32, #tpu.memory_space<vmem>>, %arg4: memref<396x640xbf16, #tpu.memory_space<vmem>>, %arg5: memref<8x640xf32, #tpu.memory_space<vmem>>, %arg6: memref<640x512xbf16, #tpu.memory_space<vmem>>, %arg7: memref<1x512xf32, #tpu.memory_space<vmem>>, %arg8: memref<1x512xf32, #tpu.memory_space<vmem>>, %arg9: memref<1x1xf32, #tpu.memory_space<vmem>>, %arg10: memref<1x1x2xf32, #tpu.memory_space<vmem>>) attributes {dimension_semantics = [#tpu.dimension_semantics<parallel>], iteration_bounds = array<i64: 1>, scalar_prefetch = 0 : i64, scratch_operands = 0 : i64, tpu.core_type = #tpu.core_type<tc>, window_params = [{transform_indices = @transform_0, window_bounds = array<i64: 2, 396>}, {pipeline_mode = #tpu.pipeline_mode<synchronous>, transform_indices = @transform_1, window_bounds = array<i64: 16, 18>}, {pipeline_mode = #tpu.pipeline_mode<synchronous>, transform_indices = @transform_2, window_bounds = array<i64: 16, 1>}, {pipeline_mode = #tpu.pipeline_mode<synchronous>, transform_indices = @transform_3, window_bounds = array<i64: 396, 640>}, {pipeline_mode = #tpu.pipeline_mode<synchronous>, transform_indices = @transform_4, window_bounds = array<i64: 8, 640>}, {pipeline_mode = #tpu.pipeline_mode<synchronous>, transform_indices = @transform_5, window_bounds = array<i64: 640, 512>}, {pipeline_mode = #tpu.pipeline_mode<synchronous>, transform_indices = @transform_6, window_bounds = array<i64: 1, 512>}, {pipeline_mode = #tpu.pipeline_mode<synchronous>, transform_indices = @transform_7, window_bounds = array<i64: 1, 512>}, {pipeline_mode = #tpu.pipeline_mode<synchronous>, transform_indices = @transform_8, window_bounds = array<i64: 1, 1>}, {transform_indices = @transform_9, window_bounds = array<i64: 1, 1, 2>}]} {
    %c0 = arith.constant 0 : index
    %c0_0 = arith.constant 0 : index
    %0 = vector.load %arg1[%c0, %c0_0] : memref<2x396xbf16, #tpu.memory_space<vmem>>, vector<2x396xbf16>
    %1 = tpu.concatenate %0, %0 in 1 : vector<2x396xbf16>, vector<2x396xbf16> -> vector<2x792xbf16>
    %2 = vector.extract_strided_slice %1 {offsets = [0, 373], sizes = [2, 396], strides = [1, 1]} : vector<2x792xbf16> to vector<2x396xbf16>
    %3 = vector.extract_strided_slice %1 {offsets = [0, 374], sizes = [2, 396], strides = [1, 1]} : vector<2x792xbf16> to vector<2x396xbf16>
    %4 = vector.extract_strided_slice %1 {offsets = [0, 375], sizes = [2, 396], strides = [1, 1]} : vector<2x792xbf16> to vector<2x396xbf16>
    %5 = vector.extract_strided_slice %1 {offsets = [0, 395], sizes = [2, 396], strides = [1, 1]} : vector<2x792xbf16> to vector<2x396xbf16>
    %6 = vector.extract_strided_slice %1 {offsets = [0, 0], sizes = [2, 396], strides = [1, 1]} : vector<2x792xbf16> to vector<2x396xbf16>
    %7 = vector.extract_strided_slice %1 {offsets = [0, 1], sizes = [2, 396], strides = [1, 1]} : vector<2x792xbf16> to vector<2x396xbf16>
    %8 = vector.extract_strided_slice %1 {offsets = [0, 21], sizes = [2, 396], strides = [1, 1]} : vector<2x792xbf16> to vector<2x396xbf16>
    %9 = vector.extract_strided_slice %1 {offsets = [0, 22], sizes = [2, 396], strides = [1, 1]} : vector<2x792xbf16> to vector<2x396xbf16>
    %10 = vector.extract_strided_slice %1 {offsets = [0, 23], sizes = [2, 396], strides = [1, 1]} : vector<2x792xbf16> to vector<2x396xbf16>
    %11 = tpu.concatenate %2, %3, %4, %5, %6, %7, %8, %9, %10 in 0 : vector<2x396xbf16>, vector<2x396xbf16>, vector<2x396xbf16>, vector<2x396xbf16>, vector<2x396xbf16>, vector<2x396xbf16>, vector<2x396xbf16>, vector<2x396xbf16>, vector<2x396xbf16> -> vector<18x396xbf16>
    %c0_1 = arith.constant 0 : index
    %c0_2 = arith.constant 0 : index
    %12 = vector.load %arg2[%c0_1, %c0_2] : memref<16x18xbf16, #tpu.memory_space<vmem>>, vector<16x18xbf16>
    %cst = arith.constant dense<0.000000e+00> : vector<16x396xf32>
    %13 = tpu.matmul %12, %11, %cst {dimension_numbers = #tpu.dot_dimension_numbers<[1], [0], [0], [1], [0, 0, 1, 1], [], []>} : vector<16x18xbf16>, vector<18x396xbf16>, vector<16x396xf32> -> vector<16x396xf32>
    %c0_3 = arith.constant 0 : index
    %c0_4 = arith.constant 0 : index
    %14 = vector.load %arg3[%c0_3, %c0_4] : memref<16x1xf32, #tpu.memory_space<vmem>>, vector<16x1xf32>
    %15 = vector.broadcast %14 : vector<16x1xf32> to vector<16x396xf32>
    %16 = arith.addf %13, %15 : vector<16x396xf32>
    %cst_5 = arith.constant 0.000000e+00 : f32
    %17 = vector.broadcast %cst_5 : f32 to vector<16x396xf32>
    %18 = arith.maximumf %16, %17 : vector<16x396xf32>
    %19 = arith.truncf %18 : vector<16x396xf32> to vector<16x396xbf16>
    %c0_6 = arith.constant 0 : index
    %c0_7 = arith.constant 0 : index
    %20 = vector.load %arg4[%c0_6, %c0_7] : memref<396x640xbf16, #tpu.memory_space<vmem>>, vector<396x640xbf16>
    %cst_8 = arith.constant dense<0.000000e+00> : vector<16x640xf32>
    %21 = tpu.matmul %19, %20, %cst_8 {dimension_numbers = #tpu.dot_dimension_numbers<[1], [0], [0], [1], [0, 0, 1, 1], [], []>} : vector<16x396xbf16>, vector<396x640xbf16>, vector<16x640xf32> -> vector<16x640xf32>
    %22 = vector.shape_cast %21 : vector<16x640xf32> to vector<2x8x640xf32>
    %c0_9 = arith.constant 0 : index
    %c0_10 = arith.constant 0 : index
    %23 = vector.load %arg5[%c0_9, %c0_10] : memref<8x640xf32, #tpu.memory_space<vmem>>, vector<8x640xf32>
    %24 = vector.shape_cast %23 : vector<8x640xf32> to vector<1x8x640xf32>
    %25 = vector.broadcast %24 : vector<1x8x640xf32> to vector<2x8x640xf32>
    %26 = arith.mulf %22, %25 : vector<2x8x640xf32>
    %cst_11 = arith.constant dense<0.000000e+00> : vector<2x640xf32>
    %27 = vector.multi_reduction <add>, %26, %cst_11 [1] : vector<2x8x640xf32> to vector<2x640xf32>
    %28 = arith.truncf %27 : vector<2x640xf32> to vector<2x640xbf16>
    %c0_12 = arith.constant 0 : index
    %c0_13 = arith.constant 0 : index
    %29 = vector.load %arg6[%c0_12, %c0_13] : memref<640x512xbf16, #tpu.memory_space<vmem>>, vector<640x512xbf16>
    %cst_14 = arith.constant dense<0.000000e+00> : vector<2x512xf32>
    %30 = tpu.matmul %28, %29, %cst_14 {dimension_numbers = #tpu.dot_dimension_numbers<[1], [0], [0], [1], [0, 0, 1, 1], [], []>} : vector<2x640xbf16>, vector<640x512xbf16>, vector<2x512xf32> -> vector<2x512xf32>
    %c0_15 = arith.constant 0 : index
    %c0_16 = arith.constant 0 : index
    %31 = vector.load %arg7[%c0_15, %c0_16] : memref<1x512xf32, #tpu.memory_space<vmem>>, vector<1x512xf32>
    %32 = vector.broadcast %31 : vector<1x512xf32> to vector<2x512xf32>
    %33 = arith.addf %30, %32 : vector<2x512xf32>
    %cst_17 = arith.constant 0.000000e+00 : f32
    %34 = vector.broadcast %cst_17 : f32 to vector<2x512xf32>
    %35 = arith.maximumf %33, %34 : vector<2x512xf32>
    %c0_18 = arith.constant 0 : index
    %c0_19 = arith.constant 0 : index
    %36 = vector.load %arg8[%c0_18, %c0_19] : memref<1x512xf32, #tpu.memory_space<vmem>>, vector<1x512xf32>
    %37 = vector.broadcast %36 : vector<1x512xf32> to vector<2x512xf32>
    %38 = arith.mulf %35, %37 : vector<2x512xf32>
    %cst_20 = arith.constant dense<0.000000e+00> : vector<2xf32>
    %39 = vector.multi_reduction <add>, %38, %cst_20 [1] : vector<2x512xf32> to vector<2xf32>
    %40 = vector.shape_cast %39 : vector<2xf32> to vector<2x1xf32>
    %c0_21 = arith.constant 0 : index
    %c0_22 = arith.constant 0 : index
    %41 = vector.load %arg9[%c0_21, %c0_22] : memref<1x1xf32, #tpu.memory_space<vmem>>, vector<1x1xf32>
    %42 = vector.broadcast %41 : vector<1x1xf32> to vector<2x1xf32>
    %43 = arith.addf %40, %42 : vector<2x1xf32>
    %44 = arith.negf %43 : vector<2x1xf32>
    %45 = math.exp %44 : vector<2x1xf32>
    %cst_23 = arith.constant 1.000000e+00 : f32
    %46 = vector.broadcast %cst_23 : f32 to vector<2x1xf32>
    %47 = arith.addf %46, %45 : vector<2x1xf32>
    %48 = arith.divf %46, %47 : vector<2x1xf32>
    %49 = tpu.transpose %48, [1, 0] : vector<2x1xf32> -> vector<1x2xf32>
    %50 = vector.shape_cast %49 : vector<1x2xf32> to vector<1x1x2xf32>
    %c0_24 = arith.constant 0 : index
    %c0_25 = arith.constant 0 : index
    %c0_26 = arith.constant 0 : index
    %51 = vector.load %arg10[%c0_24, %c0_25, %c0_26] : memref<1x1x2xf32, #tpu.memory_space<vmem>>, vector<1x1x2xf32>
    tpu.vector_store %arg10[%c0_24, %c0_25, %c0_26], %50 {strides = array<i32>} : memref<1x1x2xf32, #tpu.memory_space<vmem>>, vector<1x1x2xf32>,
    return
  }
  func.func @transform_0(%arg0: i32) -> (i32, i32) {
    %c0_i32 = arith.constant 0 : i32
    %c0_i32_0 = arith.constant 0 : i32
    return %arg0, %c0_i32 : i32, i32
  }
  func.func @transform_1(%arg0: i32) -> (i32, i32) {
    %c0_i32 = arith.constant 0 : i32
    %c0_i32_0 = arith.constant 0 : i32
    %c0_i32_1 = arith.constant 0 : i32
    return %c0_i32, %c0_i32_0 : i32, i32
  }
  func.func @transform_2(%arg0: i32) -> (i32, i32) {
    %c0_i32 = arith.constant 0 : i32
    %c0_i32_0 = arith.constant 0 : i32
    %c0_i32_1 = arith.constant 0 : i32
    return %c0_i32, %c0_i32_0 : i32, i32
  }
  func.func @transform_3(%arg0: i32) -> (i32, i32) {
    %c0_i32 = arith.constant 0 : i32
    %c0_i32_0 = arith.constant 0 : i32
    %c0_i32_1 = arith.constant 0 : i32
    return %c0_i32, %c0_i32_0 : i32, i32
  }
  func.func @transform_4(%arg0: i32) -> (i32, i32) {
    %c0_i32 = arith.constant 0 : i32
    %c0_i32_0 = arith.constant 0 : i32
    %c0_i32_1 = arith.constant 0 : i32
    return %c0_i32, %c0_i32_0 : i32, i32
  }
  func.func @transform_5(%arg0: i32) -> (i32, i32) {
    %c0_i32 = arith.constant 0 : i32
    %c0_i32_0 = arith.constant 0 : i32
    %c0_i32_1 = arith.constant 0 : i32
    return %c0_i32, %c0_i32_0 : i32, i32
  }
  func.func @transform_6(%arg0: i32) -> (i32, i32) {
    %c0_i32 = arith.constant 0 : i32
    %c0_i32_0 = arith.constant 0 : i32
    %c0_i32_1 = arith.constant 0 : i32
    return %c0_i32, %c0_i32_0 : i32, i32
  }
  func.func @transform_7(%arg0: i32) -> (i32, i32) {
    %c0_i32 = arith.constant 0 : i32
    %c0_i32_0 = arith.constant 0 : i32
    %c0_i32_1 = arith.constant 0 : i32
    return %c0_i32, %c0_i32_0 : i32, i32
  }
  func.func @transform_8(%arg0: i32) -> (i32, i32) {
    %c0_i32 = arith.constant 0 : i32
    %c0_i32_0 = arith.constant 0 : i32
    %c0_i32_1 = arith.constant 0 : i32
    return %c0_i32, %c0_i32_0 : i32, i32
  }
  func.func @transform_9(%arg0: i32) -> (i32, i32, i32) {
    %c0_i32 = arith.constant 0 : i32
    %c0_i32_0 = arith.constant 0 : i32
    %c0_i32_1 = arith.constant 0 : i32
    return %arg0, %c0_i32, %c0_i32_0 : i32, i32, i32
  }
}

</mosaic_0001>

<bundles_post_ra>
// kernel: tpu_custom_call.1
= control target key start
LH: loop header
LB: loop body
LE: loop exit
PB: predicated region body
PF: predicated region fallthrough
CT: control target
= control target key end

     0   :  { %s4317_s0 = inlined_call_operand.vmem [shape: bf16[2,396], index: 0, kind: input, shape index: {}]   ;;  %s4318_s1 = inlined_call_operand.vmem [shape: bf16[16,18], index: 1, kind: input, shape index: {}]   ;;  %s4319_s2 = inlined_call_operand.vmem [shape: f32[16,1], index: 2, kind: input, shape index: {}]   ;;  %s4320_s3 = inlined_call_operand.hbm [shape: bf16[396,640], index: 3, kind: input, shape index: {}]   ;;  %s4321_s4 = inlined_call_operand.hbm [shape: f32[8,640], index: 4, kind: input, shape index: {}]   ;;  %s4322_s5 = inlined_call_operand.hbm [shape: bf16[640,512], index: 5, kind: input, shape index: {}]   ;;  %s4323_s6 = inlined_call_operand.vmem [shape: f32[1,512], index: 6, kind: input, shape index: {}]   ;;  %s4324_s7 = inlined_call_operand.vmem [shape: f32[1,512], index: 7, kind: input, shape index: {}]   ;;  %s4325_s8 = inlined_call_operand.<no memory space> [shape: f32[1,1], index: 8, kind: input, shape index: {}]   ;;  %s4326_s9 = inlined_call_operand.hbm [shape: f32[1,1,2], index: 9, kind: output, shape index: {}]  }
   0x1   :  { %v14_v0 = vstv %s4325_s8 }
   0x2   :  { %15 = vst [vmem:[#allocation2] sm:$0x1] %v14_v0 }
   0x3   :  { %16 = vsyncpa [#allocation4], 0 }
   0x4   :  { %17 = vsyncpa [#allocation7], 0 }
   0x5   :  { %18 = vsyncpa [#allocation5], 0  ;;  %s3906_s11 = smov [#allocation6]   ;;  %s3907_s13 = smov [#allocation3]  }
   0x6   :  { %s43_s12 = sshll.u32 %s3906_s11, 4  ;;  %s30_s14 = sshll.u32 %s3907_s13, 4  ;;  %s44_s12 = int_to_ptr.vmem [resolvable:$true] %s43_s12  ;;  %s3979_s14 = int_to_ptr.vmem [resolvable:$true] %s30_s14 }
   0x7   :  { %s3812_s17 = scalar_lea.hbm %s4321_s4, 640 }
   0x8   :  { %p3813_p0 = scmp.ne.s32.totalorder %s4321_s4, %s3812_s17  ;;  %p3816_p1 = scmp.lt.u32.totalorder %s3812_s17, %s4321_s4 }
   0xa   :  { %p3818_p2 = pnand %p3816_p1, %p3813_p0 }
   0xc   :  { %3821 = shalt.err (!%p3818_p2)
}
   0xd   :  { %s3822_s21 = scalar_lea.vmem %s44_s12, 640  ;;  %p3827_p4 = scmp.lt.s32.totalorder %s44_s12, %s44_s12 }
   0xe   :  { %p3823_p3 = scmp.ne.s32.totalorder %s44_s12, %s3822_s21  ;;  %p3828_p5 = scmp.lt.s32.totalorder %s3822_s21, %s3822_s21 }
  0x10   :  { %p3829_p6 = por %p3828_p5, %p3827_p4 }
  0x12   :  { %p3830_p7 = pnand %p3829_p6, %p3823_p3 }
  0x14   :  { %3833 = shalt.err (!%p3830_p7)
}
  0x15   :  { %46 = dma.hbm_to_vmem [thread:$0]  %s4321_s4, 640, %s44_s12, [#allocation7]  }
  0x16   :  { %s3834_s26 = scalar_lea.hbm %s4320_s3, 16000 }
  0x17   :  { %p3835_p8 = scmp.ne.s32.totalorder %s4320_s3, %s3834_s26  ;;  %p3838_p9 = scmp.lt.u32.totalorder %s3834_s26, %s4320_s3 }
  0x19   :  { %p3840_p10 = pnand %p3838_p9, %p3835_p8 }
  0x1b   :  { %3843 = shalt.err (!%p3840_p10)
}
  0x1c   :  { %s3844_s10 = scalar_lea.vmem %s3979_s14, 16000  ;;  %p3849_p12 = scmp.lt.s32.totalorder %s3979_s14, %s3979_s14 }
  0x1d   :  { %p3845_p11 = scmp.ne.s32.totalorder %s3979_s14, %s3844_s10  ;;  %p3850_p13 = scmp.lt.s32.totalorder %s3844_s10, %s3844_s10 }
  0x1f   :  { %p3851_p0 = por %p3850_p13, %p3849_p12 }
  0x21   :  { %p3852_p1 = pnand %p3851_p0, %p3845_p11 }
  0x23   :  { %3855 = shalt.err (!%p3852_p1)
}
  0x24   :  { %s3908_s4 = smov 320   ;;  %s3909_s11 = smov 20  }
  0x25   :  { %36 = dma.hbm_to_vmem [thread:$0]  %s4320_s3, 16000, %s3979_s14, [#allocation4], %s3908_s4, %s3908_s4, %s3909_s11  }
  0x26   :  { %s3910_s15 = smov [#allocation8]   ;;  %s3856_s19 = scalar_lea.hbm %s4322_s5, 20480 }
  0x27   :  { %s52_s16 = sshll.u32 %s3910_s15, 4  ;;  %p3857_p2 = scmp.ne.s32.totalorder %s4322_s5, %s3856_s19  ;;  %s53_s16 = int_to_ptr.vmem [resolvable:$true] %s52_s16 }
  0x28   :  { %p3860_p3 = scmp.lt.u32.totalorder %s3856_s19, %s4322_s5 }
  0x2a   :  { %p3862_p4 = pnand %p3860_p3, %p3857_p2 }
  0x2c   :  { %3865 = shalt.err (!%p3862_p4)
}
  0x2d   :  { %s3866_s23 = scalar_lea.vmem %s53_s16, 20480  ;;  %p3871_p6 = scmp.lt.s32.totalorder %s53_s16, %s53_s16 }
  0x2e   :  { %p3867_p5 = scmp.ne.s32.totalorder %s53_s16, %s3866_s23  ;;  %p3872_p7 = scmp.lt.s32.totalorder %s3866_s23, %s3866_s23 }
  0x30   :  { %p3873_p8 = por %p3872_p7, %p3871_p6 }
  0x32   :  { %p3874_p9 = pnand %p3873_p8, %p3867_p5 }
  0x34   :  { %3877 = shalt.err (!%p3874_p9)
}
  0x35   :  { %s3911_s3 = smov 256   ;;  %s3912_s14 = smov 16  }
  0x36   :  { %58 = dma.hbm_to_vmem [thread:$0]  %s4322_s5, 20480, %s53_s16, [#allocation7], %s3911_s3, %s3911_s3, %s3912_s14  }
  0x37   :  { %3900 = dma.done.wait [#allocation4], 16000  }
  0x38   :  { %3901 = vsyncadd [#allocation4], 4294951296 }
  0x39   :  { %3902 = dma.done.wait [#allocation7], 21120  }
  0x3a   :  { %3903 = vsyncadd [#allocation7], 4294946176  ;;  %v88_v1 = vlaneseq  ;;  %v3913_v2 = vmov 1966171168   ;;  %s3914_s5 = smov 12   ;;  %s3916_s28 = smov 127  }
  0x3b   :  { %v86_v3 = vunpack.c.l.s4 %v3913_v2  ;;  %v3021_v7 = vld.sshfl [vmem:[%s4317_s0] sm:$0x33 pattern:$0x75316420]  ;;  %s3915_s0 = smov 116   ;;  %s3917_s29 = smov 117  }
  0x3c   :  { %v4022_v4 = vshrl.u32 %v88_v1, 7  ;;  %v84_v9 = vcombine.high %v3021_v7, %v3021_v7  ;;  %s3918_s30 = smov 126   ;;  %s3919_s10 = smov 96   ;;  %vm109_vm0 = vcmask 97280   ;;  %vm133_vm1 = vcmask 1039360  }
  0x3d   :  { %v87_v5 = vunpack.c.0.s8 %v86_v3  ;;  %s3920_s4 = smov 95   ;;  %s3921_s11 = smov 106   ;;  %vm153_vm2 = vcmask 1031168   ;;  %vm250_vm3 = vcmask 1040384   ;;  %vm265_vm4 = vcmask 1041408  }
  0x3e   :  { %s3922_s12 = smov 94   ;;  %vm276_vm5 = vcmask 1042432   ;;  %vm287_vm6 = vcmask 1043456   ;;  %vm298_vm7 = vcmask 1044480   ;;  %vm309_vm8 = vcmask 1045504   ;;  %s3923_s13 = smov 11  }
  0x3f   :  { %v90_v6 = vsub.s32 %v87_v5, %v4022_v4  ;;  %vm170_vm9 = vcmask 867328   ;;  %vm320_vm10 = vcmask 1046528   ;;  %vm186_vm11 = vcmask 957440  }
  0x40   :  { %vm202_vm12 = vcmask 949248   ;;  %vm218_vm13 = vcmask 785408   ;;  %vm234_vm14 = vcmask 777216   ;;  %vm246_vm15 = vcmask 769024  }
  0x41   :  { %v4028_v8 = vrot.slane %v3021_v7, %v90_v6  ;;  %v4031_v10 = vrot.slane %v84_v9, %v90_v6 }
  0x43   :  { %101 = vrot.lane.b32.xlu0 %v4028_v8, %s3914_s5  ;;  %v4035_v11 = vcombine.high %v4028_v8, %v4028_v8  ;;  %v100_v12 = vcombine.high %v4031_v10, %v4031_v10  ;;  %v190_v13 = vrot.slane %v4028_v8, 3  ;;  %v175_v15 = vrot.slane %v4031_v10, 4 }
  0x44   :  { %v174_v18 = vrot.slane %v4028_v8, 4  ;;  %v207_v19 = vrot.slane %v4031_v10, 2  ;;  %v222_v20 = vrot.slane %v4028_v8, 1  ;;  %v191_v21 = vrot.slane %v4031_v10, 3 }
  0x45   :  { %105 = vrot.lane.b32.xlu1 %v4035_v11, %s3914_s5  ;;  %v118_v14 = vrot.slane %v4035_v11, 7  ;;  %v138_v16 = vrot.slane %v4035_v11, 6  ;;  %v192_v17 = vrot.slane %v4035_v11, 3  ;;  %v206_v22 = vrot.slane %v4028_v8, 2 }
  0x46   :  { %v208_v23 = vrot.slane %v4035_v11, 2  ;;  %v223_v37 = vrot.slane %v4031_v10, 1  ;;  %v224_v40 = vrot.slane %v4035_v11, 1 }
  0x47   :  { %103 = vrot.lane.b32.xlu0 %v4031_v10, %s3914_s5 }
  0x49   :  { %107 = vrot.lane.b32.xlu1 %v100_v12, %s3914_s5 }
  0x4b   :  { %194 = vrot.lane.b32.xlu0 %v190_v13, %s3915_s0 }
  0x4d   :  { %123 = vrot.lane.b32.xlu1 %v118_v14, %s3916_s28 }
  0x4f   :  { %180 = vrot.lane.b32.xlu0 %v175_v15, %s3917_s29 }
  0x51   :  { %143 = vrot.lane.b32.xlu1 %v138_v16, %s3918_s30 }
  0x53   :  { %198 = vrot.lane.b32.xlu0 %v192_v17, %s3915_s0 }
  0x55   :  { %178 = vrot.lane.b32.xlu1 %v174_v18, %s3917_s29 }
  0x57   :  { %212 = vrot.lane.b32.xlu0 %v207_v19, %s3919_s10 }
  0x59   :  { %182 = vrot.lane.b32.xlu1 %v4035_v11, %s3917_s29 }
  0x5b   :  { %226 = vrot.lane.b32.xlu0 %v222_v20, %s3920_s4 }
  0x5d   :  { %196 = vrot.lane.b32.xlu1 %v191_v21, %s3915_s0 }
  0x61   :  { %210 = vrot.lane.b32.xlu1 %v206_v22, %s3919_s10 }
  0x65   :  { %214 = vrot.lane.b32.xlu1 %v208_v23, %s3919_s10 }
  0xb5   :  { %v102_v24 = vpop.permute.xlu0 %101 }
  0xb6   :  { %v4066_v25 = vsel %vm109_vm0, %v100_v12, %v102_v24 }
  0xb7   :  { %v119_v26 = vrot.slane %v4066_v25, 7  ;;  %v139_v30 = vrot.slane %v4066_v25, 6  ;;  %v106_v31 = vpop.permute.xlu1 %105  ;;  %v158_v33 = vrot.slane %v4066_v25, 5  ;;  %v177_v42 = vrot.slane %v4066_v25, 4 }
  0xb8   :  { %v193_v45 = vrot.slane %v4066_v25, 3  ;;  %v209_v46 = vrot.slane %v4066_v25, 2  ;;  %v225_v49 = vrot.slane %v4066_v25, 1 }
  0xb9   :  { %v104_v27 = vpop.permute.xlu0 %103  ;;  %125 = vrot.lane.b32.xlu0 %v119_v26, %s3916_s28 }
  0xba   :  { %v4071_v28 = vsel %vm109_vm0, %v102_v24, %v104_v27  ;;  %v4080_v34 = vsel %vm109_vm0, %v104_v27, %v106_v31 }
  0xbb   :  { %v120_v29 = vrot.slane %v4071_v28, 7  ;;  %v140_v32 = vrot.slane %v4071_v28, 6  ;;  %v159_v35 = vrot.slane %v4071_v28, 5  ;;  %v121_v36 = vrot.slane %v4080_v34, 7  ;;  %v108_v41 = vpop.permute.xlu1 %107 }
  0xbc   :  { %v141_v38 = vrot.slane %v4080_v34, 6  ;;  %v160_v39 = vrot.slane %v4080_v34, 5  ;;  %v4100_v43 = vsel %vm109_vm0, %v106_v31, %v108_v41 }
  0xbd   :  { %127 = vrot.lane.b32.xlu1 %v120_v29, %s3916_s28  ;;  %145 = vrot.lane.b32.xlu0 %v139_v30, %s3918_s30  ;;  %v142_v44 = vrot.slane %v4100_v43, 6  ;;  %v122_v47 = vrot.slane %v4100_v43, 7  ;;  %v161_v48 = vrot.slane %v4100_v43, 5  ;;  %v195_v51 = vpop.permute.xlu0 %194 }
  0xbf   :  { %v124_v50 = vpop.permute.xlu1 %123 }
  0xc1   :  { %147 = vrot.lane.b32.xlu1 %v140_v32, %s3918_s30  ;;  %162 = vrot.lane.b32.xlu0 %v158_v33, %s3921_s11  ;;  %v4117_v53 = vpop.permute.xlu0 %180 }
  0xc3   :  { %v144_v52 = vpop.permute.xlu1 %143 }
  0xc5   :  { %164 = vrot.lane.b32.xlu1 %v159_v35, %s3921_s11  ;;  %129 = vrot.lane.b32.xlu0 %v121_v36, %s3916_s28  ;;  %v4119_v55 = vpop.permute.xlu0 %198 }
  0xc7   :  { %v179_v54 = vpop.permute.xlu1 %178 }
  0xc8   :  { %v187_v20 = vsel %vm186_vm11, %v179_v54, %v4117_v53 }
  0xc9   :  { %228 = vrot.lane.b32.xlu1 %v223_v37, %s3920_s4  ;;  %149 = vrot.lane.b32.xlu0 %v141_v38, %s3918_s30  ;;  %v4123_v57 = vpop.permute.xlu0 %212 }
  0xcb   :  { %v4121_v56 = vpop.permute.xlu1 %182 }
  0xcc   :  { %v188_v41 = vsel %vm186_vm11, %v4117_v53, %v4121_v56 }
  0xcd   :  { %238 = vrot.lane.b32.xlu1 %v4028_v8, %s3922_s12  ;;  %166 = vrot.lane.b32.xlu0 %v160_v39, %s3921_s11  ;;  %v227_v60 = vpop.permute.xlu0 %226 }
  0xcf   :  { %v4125_v58 = vpop.permute.xlu1 %196 }
  0xd0   :  { %v203_v22 = vsel %vm202_vm12, %v195_v51, %v4125_v58 }
  0xd1   :  { %242 = vrot.lane.b32.xlu1 %v4035_v11, %s3922_s12  ;;  %230 = vrot.lane.b32.xlu0 %v224_v40, %s3920_s4  ;;  %v3924_v40 = vmov 0  }
  0xd2   :  { %436 = vmatprep.mubr.bf16.mxu0 %v3924_v40  ;;  %479 = vmatprep.mubr.bf16.mxu1 %v3924_v40 }
  0xd3   :  { %v211_v59 = vpop.permute.xlu1 %210  ;;  %3390 = vset.pattern.permute.xlu0 %v3924_v40  ;;  %3391 = vset.pattern.permute.xlu1 %v3924_v40 }
  0xd4   :  { %v219_v24 = vsel %vm218_vm13, %v211_v59, %v4123_v57 }
  0xd5   :  { %184 = vrot.lane.b32.xlu1 %v177_v42, %s3917_s29  ;;  %240 = vrot.lane.b32.xlu0 %v4031_v10, %s3922_s12 }
  0xd7   :  { %v4127_v61 = vpop.permute.xlu1 %214 }
  0xd9   :  { %151 = vrot.lane.b32.xlu1 %v142_v44, %s3918_s30  ;;  %200 = vrot.lane.b32.xlu0 %v193_v45, %s3915_s0  ;;  %v220_v45 = vsel %vm218_vm13, %v4123_v57, %v4127_v61 }
  0xdd   :  { %216 = vrot.lane.b32.xlu1 %v209_v46, %s3919_s10  ;;  %131 = vrot.lane.b32.xlu0 %v122_v47, %s3916_s28 }
  0xe1   :  { %244 = vrot.lane.b32.xlu1 %v4066_v25, %s3922_s12  ;;  %168 = vrot.lane.b32.xlu0 %v161_v48, %s3921_s11 }
  0xe5   :  { %232 = vrot.lane.b32.xlu0 %v225_v49, %s3920_s4 }
 0x12b   :  { %v126_v62 = vpop.permute.xlu0 %125 }
 0x12c   :  { %v134_v63 = vsel %vm133_vm1, %v124_v50, %v126_v62 }
 0x12d   :  { %v253_v3 = vsel %vm250_vm3, %v4035_v11, %v134_v63 }
 0x12f   :  { %v128_v0 = vpop.permute.xlu1 %127  ;;  %v146_v1 = vpop.permute.xlu0 %145 }
 0x130   :  { %v154_v2 = vsel %vm153_vm2, %v144_v52, %v146_v1  ;;  %v135_v8 = vsel %vm133_vm1, %v126_v62, %v128_v0 }
 0x131   :  { %v267_v6 = vsel %vm265_vm4, %v253_v3, %v154_v2  ;;  %v255_v13 = vsel %vm250_vm3, %v4066_v25, %v135_v8 }
 0x133   :  { %v148_v5 = vpop.permute.xlu1 %147  ;;  %v163_v7 = vpop.permute.xlu0 %162 }
 0x134   :  { %v278_v9 = vsel %vm276_vm5, %v267_v6, %v163_v7  ;;  %v155_v10 = vsel %vm153_vm2, %v146_v1, %v148_v5 }
 0x135   :  { %v289_v12 = vsel %vm287_vm6, %v278_v9, %v179_v54  ;;  %v269_v17 = vsel %vm265_vm4, %v255_v13, %v155_v10 }
 0x136   :  { %v300_v11 = vsel %vm298_vm7, %v289_v12, %v195_v51 }
 0x137   :  { %v165_v14 = vpop.permute.xlu1 %164  ;;  %v130_v15 = vpop.permute.xlu0 %129  ;;  %v311_v16 = vsel %vm309_vm8, %v300_v11, %v211_v59 }
 0x138   :  { %v171_v18 = vsel %vm170_vm9, %v163_v7, %v165_v14  ;;  %v322_v19 = vsel %vm320_vm10, %v311_v16, %v227_v60  ;;  %v136_v29 = vsel %vm133_vm1, %v128_v0, %v130_v15 }
 0x139   :  { %v280_v21 = vsel %vm276_vm5, %v269_v17, %v171_v18  ;;  %355 = vrot.lane.b32.xlu0 %v322_v19, %s3923_s13  ;;  %v258_v35 = vsel %vm250_vm3, %v4071_v28, %v136_v29  ;;  %v204_v28 = vsel %vm202_vm12, %v4125_v58, %v4119_v55 }
 0x13a   :  { %v291_v23 = vsel %vm287_vm6, %v280_v21, %v187_v20  ;;  %v334_v20 = vld [vmem:[%s4319_s2 + $0x8] sm:$0xff]  ;;  %v333_v21 = vld [vmem:[%s4319_s2] sm:$0xff] }
 0x13b   :  { %v229_v25 = vpop.permute.xlu1 %228  ;;  %v150_v26 = vpop.permute.xlu0 %149  ;;  %v302_v27 = vsel %vm298_vm7, %v291_v23, %v203_v22 }
 0x13c   :  { %v235_v30 = vsel %vm234_vm14, %v227_v60, %v229_v25  ;;  %v313_v31 = vsel %vm309_vm8, %v302_v27, %v219_v24  ;;  %v156_v32 = vsel %vm153_vm2, %v148_v5, %v150_v26 }
 0x13d   :  { %v324_v33 = vsel %vm320_vm10, %v313_v31, %v235_v30  ;;  %v271_v38 = vsel %vm265_vm4, %v258_v35, %v156_v32  ;;  %v3395_v32 = vld [vmem:[#allocation3 + $0x4] ss:$20 sps:$4 sm:$0xff]  }
 0x13e   :  { %357 = vrot.lane.b32.xlu0 %v324_v33, %s3923_s13 }
 0x13f   :  { %v239_v36 = vpop.permute.xlu1 %238  ;;  %v167_v37 = vpop.permute.xlu0 %166 }
 0x140   :  { %v172_v39 = vsel %vm170_vm9, %v165_v14, %v167_v37  ;;  %365 = vrot.lane.b32.xlu1 %v239_v36, %s3923_s13 }
 0x141   :  { %v282_v42 = vsel %vm276_vm5, %v271_v38, %v172_v39  ;;  %v3401_v38 = vld [vmem:[#allocation3 + $0x2c] ss:$20 sps:$4 sm:$0xff]   ;;  %v3399_v39 = vld [vmem:[#allocation3 + $0x28] ss:$20 sps:$4 sm:$0xff]  }
 0x142   :  { %v293_v44 = vsel %vm287_vm6, %v282_v42, %v188_v41  ;;  %v3407_v41 = vld [vmem:[#allocation3 + $0x54] ss:$20 sps:$4 sm:$0xff]   ;;  %v3405_v42 = vld [vmem:[#allocation3 + $0x50] ss:$20 sps:$4 sm:$0xff]  }
 0x143   :  { %v243_v46 = vpop.permute.xlu1 %242  ;;  %v231_v47 = vpop.permute.xlu0 %230  ;;  %v304_v48 = vsel %vm298_vm7, %v293_v44, %v204_v28  ;;  %v3413_v28 = vld [vmem:[#allocation3 + $0x7c] ss:$20 sps:$4 sm:$0xff]  }
 0x144   :  { %v236_v49 = vsel %vm234_vm14, %v229_v25, %v231_v47  ;;  %v315_v50 = vsel %vm309_vm8, %v304_v48, %v220_v45  ;;  %v3411_v45 = vld [vmem:[#allocation3 + $0x78] ss:$20 sps:$4 sm:$0xff]  }
 0x145   :  { %v326_v51 = vsel %vm320_vm10, %v315_v50, %v236_v49 }
 0x146   :  { %359 = vrot.lane.b32.xlu1 %v326_v51, %s3923_s13  ;;  %v3417_v51 = vld [vmem:[#allocation3 + $0xa0] ss:$20 sps:$4 sm:$0xff]  }
 0x147   :  { %v241_v52 = vpop.permute.xlu0 %240  ;;  %v185_v53 = vpop.permute.xlu1 %184 }
 0x148   :  { %v247_v54 = vsel %vm246_vm15, %v239_v36, %v241_v52  ;;  %v248_v58 = vsel %vm246_vm15, %v241_v52, %v243_v46  ;;  %v189_v9 = vsel %vm186_vm11, %v4121_v56, %v185_v53  ;;  %v3392_v36 = vld [vmem:[%s4318_s1] sm:$0xff]  }
 0x149   :  { %367 = vrot.lane.b32.xlu0 %v247_v54, %s3923_s13  ;;  %v3425_v54 = vld [vmem:[#allocation3 + $0xcc] ss:$20 sps:$4 sm:$0xff]  }
 0x14a   :  { %369 = vrot.lane.b32.xlu1 %v248_v58, %s3923_s13 }
 0x14b   :  { %v201_v57 = vpop.permute.xlu0 %200  ;;  %v152_v59 = vpop.permute.xlu1 %151 }
 0x14c   :  { %v157_v1 = vsel %vm153_vm2, %v150_v26, %v152_v59  ;;  %vm388_vm2 = vcmask 146432  }
 0x14f   :  { %v132_v60 = vpop.permute.xlu0 %131  ;;  %v217_v5 = vpop.permute.xlu1 %216 }
 0x150   :  { %v137_v62 = vsel %vm133_vm1, %v130_v15, %v132_v60  ;;  %v264_v63 = vsel %vm250_vm3, %v4100_v43, %v132_v60  ;;  %v221_v13 = vsel %vm218_vm13, %v4127_v61, %v217_v5  ;;  %vm375_vm1 = vcmask 89088   ;;  %v3396_v60 = vld [vmem:[#allocation3 + $0x8] ss:$20 sps:$4 sm:$0xff]  }
 0x151   :  { %v261_v0 = vsel %vm250_vm3, %v4080_v34, %v137_v62  ;;  %v275_v2 = vsel %vm265_vm4, %v264_v63, %v152_v59  ;;  %v205_v34 = vsel %vm202_vm12, %v4119_v55, %v201_v57  ;;  %v3423_v62 = vld [vmem:[#allocation3 + $0xc8] ss:$20 sps:$4 sm:$0xff]  }
 0x152   :  { %v273_v6 = vsel %vm265_vm4, %v261_v0, %v157_v1  ;;  %v3404_v63 = vld [vmem:[#allocation3 + $0x34] ss:$20 sps:$4 sm:$0xff]   ;;  %v3402_v1 = vld [vmem:[#allocation3 + $0x30] ss:$20 sps:$4 sm:$0xff]  }
 0x153   :  { %v169_v3 = vpop.permute.xlu0 %168  ;;  %v245_v19 = vpop.permute.xlu1 %244  ;;  %v3431_v0 = vld [vmem:[#allocation3 + $0xf4] ss:$20 sps:$4 sm:$0xff]  }
 0x154   :  { %v173_v7 = vsel %vm170_vm9, %v167_v37, %v169_v3  ;;  %v286_v8 = vsel %vm276_vm5, %v275_v2, %v169_v3  ;;  %v249_v61 = vsel %vm246_vm15, %v243_v46, %v245_v19  ;;  %v3393_v37 = vld [vmem:[#allocation3] ss:$20 sps:$4 sm:$0xff]   ;;  %v3429_v2 = vld [vmem:[#allocation3 + $0xf0] ss:$20 sps:$4 sm:$0xff]  }
 0x155   :  { %v284_v43 = vsel %vm276_vm5, %v273_v6, %v173_v7  ;;  %v297_v10 = vsel %vm287_vm6, %v286_v8, %v185_v53  ;;  %v3398_v53 = vld [vmem:[#allocation3 + $0xc] ss:$20 sps:$4 sm:$0xff]   ;;  %v3410_v3 = vld [vmem:[#allocation3 + $0x5c] ss:$20 sps:$4 sm:$0xff]   ;;  %v3416_v8 = vld [vmem:[#allocation3 + $0x84] ss:$20 sps:$4 sm:$0xff]  }
 0x156   :  { %v295_v12 = vsel %vm287_vm6, %v284_v43, %v189_v9  ;;  %v308_v11 = vsel %vm298_vm7, %v297_v10, %v201_v57  ;;  %v3408_v6 = vld [vmem:[#allocation3 + $0x58] ss:$20 sps:$4 sm:$0xff]   ;;  %v3414_v43 = vld [vmem:[#allocation3 + $0x80] ss:$20 sps:$4 sm:$0xff]  }
 0x157   :  { %v233_v14 = vpop.permute.xlu0 %232  ;;  %v319_v15 = vsel %vm309_vm8, %v308_v11, %v217_v5  ;;  %v306_v16 = vsel %vm298_vm7, %v295_v12, %v205_v34  ;;  %v3437_v5 = vld [vmem:[#allocation3 + $0x11c] ss:$20 sps:$4 sm:$0xff]   ;;  %v3435_v7 = vld [vmem:[#allocation3 + $0x118] ss:$20 sps:$4 sm:$0xff]   ;;  %v3441_v10 = vld [vmem:[#allocation3 + $0x140] ss:$20 sps:$4 sm:$0xff]  }
 0x158   :  { %v237_v56 = vsel %vm234_vm14, %v231_v47, %v233_v14  ;;  %v330_v17 = vsel %vm320_vm10, %v319_v15, %v233_v14  ;;  %v317_v18 = vsel %vm309_vm8, %v306_v16, %v221_v13  ;;  %v3419_v47 = vld [vmem:[#allocation3 + $0xa4] ss:$20 sps:$4 sm:$0xff]   ;;  %v3422_v34 = vld [vmem:[#allocation3 + $0xac] ss:$20 sps:$4 sm:$0xff]   ;;  %v3420_v11 = vld [vmem:[#allocation3 + $0xa8] ss:$20 sps:$4 sm:$0xff]  }
 0x159   :  { %363 = vrot.lane.b32.xlu1 %v330_v17, %s3923_s13  ;;  %v328_v55 = vsel %vm320_vm10, %v317_v18, %v237_v56  ;;  %v3443_v9 = vld [vmem:[#allocation3 + $0x144] ss:$20 sps:$4 sm:$0xff]   ;;  %v3449_v12 = vld [vmem:[#allocation3 + $0x16c] ss:$20 sps:$4 sm:$0xff]   ;;  %v3447_v13 = vld [vmem:[#allocation3 + $0x168] ss:$20 sps:$4 sm:$0xff]  }
 0x15a   :  { %361 = vrot.lane.b32.xlu0 %v328_v55, %s3923_s13  ;;  %v3428_v14 = vld [vmem:[#allocation3 + $0xd4] ss:$20 sps:$4 sm:$0xff]   ;;  %v3426_v16 = vld [vmem:[#allocation3 + $0xd0] ss:$20 sps:$4 sm:$0xff]   ;;  %v3432_v55 = vld [vmem:[#allocation3 + $0xf8] ss:$20 sps:$4 sm:$0xff]  }
 0x15b   :  { %v3455_v15 = vld [vmem:[#allocation3 + $0x194] ss:$20 sps:$4 sm:$0xff]   ;;  %v3453_v56 = vld [vmem:[#allocation3 + $0x190] ss:$20 sps:$4 sm:$0xff]  }
 0x15c   :  { %v3434_v17 = vld [vmem:[#allocation3 + $0xfc] ss:$20 sps:$4 sm:$0xff]  }
 0x15d   :  { %373 = vrot.lane.b32.xlu1 %v245_v19, %s3923_s13  ;;  %v3461_v18 = vld [vmem:[#allocation3 + $0x1bc] ss:$20 sps:$4 sm:$0xff]   ;;  %v3459_v19 = vld [vmem:[#allocation3 + $0x1b8] ss:$20 sps:$4 sm:$0xff]  }
 0x15e   :  { %371 = vrot.lane.b32.xlu0 %v249_v61, %s3923_s13  ;;  %v3440_v61 = vld [vmem:[#allocation3 + $0x124] ss:$20 sps:$4 sm:$0xff]  }
 0x161   :  { %342 = vperm.xlu1 %3391, %v334_v20   ;;  %v3467_v20 = vld [vmem:[#allocation3 + $0x1e4] ss:$20 sps:$4 sm:$0xff]  }
 0x162   :  { %337 = vperm.xlu0 %3390, %v333_v21   ;;  %v3438_v21 = vld [vmem:[#allocation3 + $0x120] ss:$20 sps:$4 sm:$0xff]  }
 0x1ab   :  { %v356_v22 = vpop.permute.xlu0 %355 }
 0x1b0   :  { %v358_v24 = vpop.permute.xlu0 %357 }
 0x1b1   :  { %v376_v27 = vsel %vm375_vm1, %v356_v22, %v358_v24  ;;  %v3465_v22 = vld [vmem:[#allocation3 + $0x1e0] ss:$20 sps:$4 sm:$0xff]  }
 0x1b2   :  { %v366_v23 = vpop.permute.xlu1 %365 }
 0x1b8   :  { %v360_v25 = vpop.permute.xlu1 %359 }
 0x1b9   :  { %v377_v26 = vsel %vm375_vm1, %v358_v24, %v360_v25  ;;  %v3473_v24 = vld [vmem:[#allocation3 + $0x20c] ss:$20 sps:$4 sm:$0xff]  }
 0x1ba   :  { %404 = vmatprep.subr.bf16.mxu0 %v377_v26  ;;  %v3471_v26 = vld [vmem:[#allocation3 + $0x208] ss:$20 sps:$4 sm:$0xff]  }
 0x1bb   :  { %405 = vmatpush1.bf16.msra.mxu0 %v376_v27  ;;  %v368_v29 = vpop.permute.xlu0 %367  ;;  %v3452_v27 = vld [vmem:[#allocation3 + $0x174] ss:$20 sps:$4 sm:$0xff]  }
 0x1bc   :  { %v380_v30 = vsel %vm375_vm1, %v366_v23, %v368_v29  ;;  %v370_v31 = vpop.permute.xlu1 %369  ;;  %v3446_v23 = vld [vmem:[#allocation3 + $0x14c] ss:$20 sps:$4 sm:$0xff]  }
 0x1bd   :  { %v381_v33 = vsel %vm375_vm1, %v368_v29, %v370_v31  ;;  %v393_v35 = vsel %vm250_vm3, %v380_v30, 0  ;;  %v3450_v29 = vld [vmem:[#allocation3 + $0x170] ss:$20 sps:$4 sm:$0xff]  }
 0x1be   :  { %3023 = vmatprep.subr.msk.bf16.mxu0 %vm250_vm3, %v381_v33  ;;  %v3458_v30 = vld [vmem:[#allocation3 + $0x19c] ss:$20 sps:$4 sm:$0xff]   ;;  %v3462_v33 = vld [vmem:[#allocation3 + $0x1c0] ss:$20 sps:$4 sm:$0xff]  }
 0x1bf   :  { %407 = vmatpush1.bf16.msra.mxu0 %v393_v35  ;;  %v3470_v35 = vld [vmem:[#allocation3 + $0x1ec] ss:$20 sps:$4 sm:$0xff]  }
 0x1c0   :  { %1315 = vmatprep.subr.bf16.mxu0 %v3395_v32  ;;  %v3464_v32 = vld [vmem:[#allocation3 + $0x1c4] ss:$20 sps:$4 sm:$0xff]  }
 0x1c2   :  { %3024 = vmatmul.mubr.msk.bf16.vlgmr.msra.gmra.mrb[0].mxu0 %vm388_vm2, %v3392_v36 }
 0x1c3   :  { %1316 = vmatpush1.bf16.msra.mxu0 %v3393_v37  ;;  %v3476_v37 = vld [vmem:[#allocation3 + $0x214] ss:$20 sps:$4 sm:$0xff]  }
 0x1c4   :  { %1317 = vmatprep.subr.bf16.mxu0 %v3401_v38  ;;  %v3474_v38 = vld [vmem:[#allocation3 + $0x210] ss:$20 sps:$4 sm:$0xff]  }
 0x1c7   :  { %1318 = vmatpush1.bf16.msra.mxu0 %v3399_v39  ;;  %v3479_v39 = vld [vmem:[#allocation3 + $0x234] ss:$20 sps:$4 sm:$0xff]  }
 0x1c8   :  { %1319 = vmatprep.subr.bf16.mxu0 %v3407_v41  ;;  %v3482_v41 = vld [vmem:[#allocation3 + $0x23c] ss:$20 sps:$4 sm:$0xff]  }
 0x1cb   :  { %v364_v44 = vpop.permute.xlu1 %363  ;;  %1320 = vmatpush1.bf16.msra.mxu0 %v3405_v42  ;;  %v3477_v42 = vld [vmem:[#allocation3 + $0x230] ss:$20 sps:$4 sm:$0xff]  }
 0x1cc   :  { %v362_v46 = vpop.permute.xlu0 %361  ;;  %1321 = vmatprep.subr.bf16.mxu0 %v3413_v28  ;;  %v3480_v28 = vld [vmem:[#allocation3 + $0x238] ss:$20 sps:$4 sm:$0xff]  }
 0x1cd   :  { %v379_v48 = vsel %vm375_vm1, %v362_v46, %v364_v44  ;;  %v378_v49 = vsel %vm375_vm1, %v360_v25, %v362_v46  ;;  %v3444_v25 = vld [vmem:[#allocation3 + $0x148] ss:$20 sps:$4 sm:$0xff]   ;;  %v3483_v46 = vld [vmem:[#allocation3 + $0x258] ss:$20 sps:$4 sm:$0xff]  }
 0x1ce   :  { %447 = vmatprep.subr.bf16.mxu1 %v379_v48  ;;  %v3485_v44 = vld [vmem:[#allocation3 + $0x25c] ss:$20 sps:$4 sm:$0xff]   ;;  %v3491_v48 = vld [vmem:[#allocation3 + $0x284] ss:$20 sps:$4 sm:$0xff]  }
 0x1cf   :  { %v374_v50 = vpop.permute.xlu1 %373  ;;  %448 = vmatpush1.bf16.msra.mxu1 %v378_v49  ;;  %1322 = vmatpush1.bf16.msra.mxu0 %v3411_v45  ;;  %v3488_v45 = vld [vmem:[#allocation3 + $0x264] ss:$20 sps:$4 sm:$0xff]   ;;  %v3494_v49 = vld [vmem:[#allocation3 + $0x28c] ss:$20 sps:$4 sm:$0xff]  }
 0x1d0   :  { %v372_v52 = vpop.permute.xlu0 %371  ;;  %1323 = vmatprep.subr.bf16.mxu0 %v3419_v47  ;;  %v3486_v47 = vld [vmem:[#allocation3 + $0x260] ss:$20 sps:$4 sm:$0xff]  }
 0x1d1   :  { %v382_v58 = vsel %vm375_vm1, %v370_v31, %v372_v52  ;;  %v383_v57 = vsel %vm375_vm1, %v372_v52, %v374_v50  ;;  %v3456_v31 = vld [vmem:[#allocation3 + $0x198] ss:$20 sps:$4 sm:$0xff]  }
 0x1d2   :  { %3025 = vmatprep.subr.msk.bf16.mxu1 %vm250_vm3, %v383_v57  ;;  %v399_v59 = vsel %vm250_vm3, %v382_v58, 0  ;;  %vm3003_vm3 = vcmask 8192  }
 0x1d3   :  { %450 = vmatpush1.bf16.msra.mxu1 %v399_v59  ;;  %1324 = vmatpush1.bf16.msra.mxu0 %v3417_v51 }
 0x1d4   :  { %1401 = vmatprep.subr.bf16.mxu1 %v3398_v53  ;;  %1325 = vmatprep.subr.bf16.mxu0 %v3425_v54 }
 0x1d6   :  { %3026 = vmatmul.mubr.msk.bf16.vlgmr.msra.gmra.mrb[0].mxu1 %vm388_vm2, %v3392_v36  ;;  %v3468_v36 = vld [vmem:[#allocation3 + $0x1e8] ss:$20 sps:$4 sm:$0xff]  }
 0x1d7   :  { %1402 = vmatpush1.bf16.msra.mxu1 %v3396_v60  ;;  %1326 = vmatpush1.bf16.msra.mxu0 %v3423_v62 }
 0x1d8   :  { %1403 = vmatprep.subr.bf16.mxu1 %v3404_v63  ;;  %1327 = vmatprep.subr.bf16.mxu0 %v3431_v0 }
 0x1db   :  { %1404 = vmatpush1.bf16.msra.mxu1 %v3402_v1  ;;  %1328 = vmatpush1.bf16.msra.mxu0 %v3429_v2 }
 0x1dc   :  { %1405 = vmatprep.subr.bf16.mxu1 %v3410_v3  ;;  %1329 = vmatprep.subr.bf16.mxu0 %v3437_v5 }
 0x1df   :  { %1406 = vmatpush1.bf16.msra.mxu1 %v3408_v6  ;;  %1330 = vmatpush1.bf16.msra.mxu0 %v3435_v7  ;;  %v3489_v6 = vld [vmem:[#allocation3 + $0x280] ss:$20 sps:$4 sm:$0xff]   ;;  %v3492_v7 = vld [vmem:[#allocation3 + $0x288] ss:$20 sps:$4 sm:$0xff]  }
 0x1e0   :  { %1407 = vmatprep.subr.bf16.mxu1 %v3416_v8  ;;  %1331 = vmatprep.subr.bf16.mxu0 %v3443_v9  ;;  %v343_v52 = vpop.permute.xlu1 %342  ;;  %v3497_v8 = vld [vmem:[#allocation3 + $0x2ac] ss:$20 sps:$4 sm:$0xff]   ;;  %v3500_v9 = vld [vmem:[#allocation3 + $0x2b4] ss:$20 sps:$4 sm:$0xff]  }
 0x1e1   :  { %v338_v50 = vpop.permute.xlu0 %337 }
 0x1e3   :  { %1408 = vmatpush1.bf16.msra.mxu1 %v3414_v43  ;;  %1332 = vmatpush1.bf16.msra.mxu0 %v3441_v10  ;;  %v3495_v43 = vld [vmem:[#allocation3 + $0x2a8] ss:$20 sps:$4 sm:$0xff]   ;;  %v3498_v10 = vld [vmem:[#allocation3 + $0x2b0] ss:$20 sps:$4 sm:$0xff]  }
 0x1e4   :  { %1409 = vmatprep.subr.bf16.mxu1 %v3422_v34  ;;  %1333 = vmatprep.subr.bf16.mxu0 %v3449_v12  ;;  %v3503_v34 = vld [vmem:[#allocation3 + $0x2d4] ss:$20 sps:$4 sm:$0xff]   ;;  %v3506_v12 = vld [vmem:[#allocation3 + $0x2dc] ss:$20 sps:$4 sm:$0xff]  }
 0x1e7   :  { %1410 = vmatpush1.bf16.msra.mxu1 %v3420_v11  ;;  %1334 = vmatpush1.bf16.msra.mxu0 %v3447_v13  ;;  %v3501_v11 = vld [vmem:[#allocation3 + $0x2d0] ss:$20 sps:$4 sm:$0xff]   ;;  %v3504_v13 = vld [vmem:[#allocation3 + $0x2d8] ss:$20 sps:$4 sm:$0xff]  }
 0x1e8   :  { %1411 = vmatprep.subr.bf16.mxu1 %v3428_v14  ;;  %1335 = vmatprep.subr.bf16.mxu0 %v3455_v15  ;;  %v3509_v14 = vld [vmem:[#allocation3 + $0x2fc] ss:$20 sps:$4 sm:$0xff]   ;;  %v3512_v15 = vld [vmem:[#allocation3 + $0x304] ss:$20 sps:$4 sm:$0xff]  }
 0x1eb   :  { %1412 = vmatpush1.bf16.msra.mxu1 %v3426_v16  ;;  %1336 = vmatpush1.bf16.msra.mxu0 %v3453_v56  ;;  %v3507_v56 = vld [vmem:[#allocation3 + $0x2f8] ss:$20 sps:$4 sm:$0xff]  }
 0x1ec   :  { %1413 = vmatprep.subr.bf16.mxu1 %v3434_v17  ;;  %1337 = vmatprep.subr.bf16.mxu0 %v3461_v18  ;;  %v3510_v17 = vld [vmem:[#allocation3 + $0x300] ss:$20 sps:$4 sm:$0xff]  }
 0x1ef   :  { %1414 = vmatpush1.bf16.msra.mxu1 %v3432_v55  ;;  %1338 = vmatpush1.bf16.msra.mxu0 %v3459_v19  ;;  %v3515_v19 = vld [vmem:[#allocation3 + $0x324] ss:$20 sps:$4 sm:$0xff]  }
 0x1f0   :  { %1415 = vmatprep.subr.bf16.mxu1 %v3440_v61  ;;  %1339 = vmatprep.subr.bf16.mxu0 %v3467_v20  ;;  %v3518_v61 = vld [vmem:[#allocation3 + $0x32c] ss:$20 sps:$4 sm:$0xff]  }
 0x1f3   :  { %1416 = vmatpush1.bf16.msra.mxu1 %v3438_v21  ;;  %1340 = vmatpush1.bf16.msra.mxu0 %v3465_v22 }
 0x1f4   :  { %1417 = vmatprep.subr.bf16.mxu1 %v3446_v23  ;;  %1341 = vmatprep.subr.bf16.mxu0 %v3473_v24 }
 0x1f7   :  { %1418 = vmatpush1.bf16.msra.mxu1 %v3444_v25  ;;  %1342 = vmatpush1.bf16.msra.mxu0 %v3471_v26  ;;  %v3513_v25 = vld [vmem:[#allocation3 + $0x320] ss:$20 sps:$4 sm:$0xff]   ;;  %v3516_v26 = vld [vmem:[#allocation3 + $0x328] ss:$20 sps:$4 sm:$0xff]  }
 0x1f8   :  { %1419 = vmatprep.subr.bf16.mxu1 %v3452_v27  ;;  %1343 = vmatprep.subr.bf16.mxu0 %v3479_v39  ;;  %v3527_v39 = vld [vmem:[#allocation3 + $0x374] ss:$20 sps:$4 sm:$0xff]  }
 0x1fb   :  { %1420 = vmatpush1.bf16.msra.mxu1 %v3450_v29  ;;  %1344 = vmatpush1.bf16.msra.mxu0 %v3477_v42  ;;  %v3525_v42 = vld [vmem:[#allocation3 + $0x370] ss:$20 sps:$4 sm:$0xff]  }
 0x1fc   :  { %1421 = vmatprep.subr.bf16.mxu1 %v3458_v30  ;;  %1345 = vmatprep.subr.bf16.mxu0 %v3485_v44  ;;  %v3521_v30 = vld [vmem:[#allocation3 + $0x34c] ss:$20 sps:$4 sm:$0xff]   ;;  %v3533_v44 = vld [vmem:[#allocation3 + $0x39c] ss:$20 sps:$4 sm:$0xff]  }
 0x1ff   :  { %1422 = vmatpush1.bf16.msra.mxu1 %v3456_v31  ;;  %1346 = vmatpush1.bf16.msra.mxu0 %v3483_v46  ;;  %v3524_v31 = vld [vmem:[#allocation3 + $0x354] ss:$20 sps:$4 sm:$0xff]   ;;  %v3531_v46 = vld [vmem:[#allocation3 + $0x398] ss:$20 sps:$4 sm:$0xff]  }
 0x200   :  { %1423 = vmatprep.subr.bf16.mxu1 %v3464_v32  ;;  %1358 = vmatprep.subr.bf16.mxu0 %v3491_v48  ;;  %v3537_v48 = vld [vmem:[#allocation3 + $0x3c4] ss:$20 sps:$4 sm:$0x3f]  }
 0x203   :  { %1424 = vmatpush1.bf16.msra.mxu1 %v3462_v33 }
 0x204   :  { %1425 = vmatprep.subr.bf16.mxu1 %v3470_v35 }
 0x207   :  { %1426 = vmatpush1.bf16.msra.mxu1 %v3468_v36 }
 0x208   :  { %1427 = vmatprep.subr.bf16.mxu1 %v3476_v37  ;;  %v3519_v37 = vld [vmem:[#allocation3 + $0x348] ss:$20 sps:$4 sm:$0xff]  }
 0x20b   :  { %1428 = vmatpush1.bf16.msra.mxu1 %v3474_v38  ;;  %v3522_v38 = vld [vmem:[#allocation3 + $0x350] ss:$20 sps:$4 sm:$0xff]  }
 0x20c   :  { %1429 = vmatprep.subr.bf16.mxu1 %v3482_v41  ;;  %v3530_v41 = vld [vmem:[#allocation3 + $0x37c] ss:$20 sps:$4 sm:$0xff]  }
 0x20f   :  { %1430 = vmatpush1.bf16.msra.mxu1 %v3480_v28  ;;  %v3528_v28 = vld [vmem:[#allocation3 + $0x378] ss:$20 sps:$4 sm:$0xff]  }
 0x210   :  { %1431 = vmatprep.subr.bf16.mxu1 %v3488_v45  ;;  %v3536_v45 = vld [vmem:[#allocation3 + $0x3a4] ss:$20 sps:$4 sm:$0xff]  }
 0x213   :  { %1432 = vmatpush1.bf16.msra.mxu1 %v3486_v47  ;;  %v3534_v47 = vld [vmem:[#allocation3 + $0x3a0] ss:$20 sps:$4 sm:$0xff]  }
 0x214   :  { %1444 = vmatprep.subr.bf16.mxu1 %v3494_v49  ;;  %v3539_v49 = vld [vmem:[#allocation3 + $0x3cc] ss:$20 sps:$4 sm:$0x3f]  }
 0x295   :  { %v438_v51 = vpop.f32.mrb[0].mxu0 }
 0x296   :  { %v440_v53 = vpop.f32.mrb[1].mxu0  ;;  %v439_v54 = vadd.f32 %v438_v51, %v338_v50  ;;  %v3542_v51 = vld [vmem:[#allocation3 + $0x3c8] ss:$20 sps:$4 sm:$0x3f]  }
 0x297   :  { %v441_v58 = vadd.f32 %v440_v53, %v338_v50  ;;  %v442_v57 = vpop.f32.mrb[2].mxu0  ;;  %v1307_v53 = vsel %vm309_vm8, %v3542_v51, 0  ;;  %v3613_v51 = vld [vmem:[#allocation8 + $0xe8] ss:$16 sps:$4 sm:$0xff]  }
 0x298   :  { %v443_v59 = vadd.f32 %v442_v57, %v343_v52  ;;  %v444_v60 = vpop.f32.mrb[3].mxu0  ;;  %v490_v63 = vmax.f32 %v439_v54, 0.0  ;;  %v3543_v54 = vld [vmem:[#allocation3 + $0x150] ss:$20 sps:$4 sm:$0xff]  }
 0x299   :  { %v445_v62 = vadd.f32 %v444_v60, %v343_v52  ;;  %v491_v1 = vmax.f32 %v441_v58, 0.0  ;;  %v3544_v58 = vld [vmem:[#allocation3 + $0x10] ss:$20 sps:$4 sm:$0xff]   ;;  %v3547_v60 = vld [vmem:[#allocation3 + $0x38] ss:$20 sps:$4 sm:$0xff]  }
 0x29a   :  { %v494_v0 = vmax.f32 %v443_v59, 0.0  ;;  %v3545_v57 = vld [vmem:[#allocation3 + $0x290] ss:$20 sps:$4 sm:$0xff]   ;;  %v3546_v59 = vld [vmem:[#allocation3 + $0x178] ss:$20 sps:$4 sm:$0xff]  }
 0x29b   :  { %v495_v2 = vmax.f32 %v445_v62, 0.0  ;;  %v3548_v62 = vld [vmem:[#allocation3 + $0x2b8] ss:$20 sps:$4 sm:$0xff]  }
 0x29c   :  { %v4244_v3 = vpack.c.bf16 %v494_v0, %v490_v63  ;;  %v3549_v63 = vld [vmem:[#allocation3 + $0x1a0] ss:$20 sps:$4 sm:$0xff]  }
 0x29d   :  { %v4246_v5 = vpack.c.bf16 %v495_v2, %v491_v1  ;;  %v3550_v0 = vld [vmem:[#allocation3 + $0x60] ss:$20 sps:$4 sm:$0xff]   ;;  %v3552_v2 = vld [vmem:[#allocation3 + $0x1c8] ss:$20 sps:$4 sm:$0xff]  }
 0x29e   :  { %v3551_v1 = vld [vmem:[#allocation3 + $0x2e0] ss:$20 sps:$4 sm:$0xff]  }
 0x29f   :  { %1347 = vmatprep.mubr.bf16.mxu0 %v4246_v5  ;;  %1433 = vmatprep.mubr.bf16.mxu1 %v4246_v5 }
 0x2a0   :  { %1348 = vmatmul.mubr.bf16.vlgmr.msra.gmra.mrb[4].mxu0 %v4244_v3  ;;  %1434 = vmatmul.mubr.bf16.vlgmr.msra.gmra.mrb[4].mxu1 %v4244_v3 }
 0x2a1   :  { %1359 = vmatpush1.bf16.msra.mxu0 %v3489_v6  ;;  %1445 = vmatpush1.bf16.msra.mxu1 %v3492_v7  ;;  %v3553_v6 = vld [vmem:[#allocation3 + $0x88] ss:$20 sps:$4 sm:$0xff]   ;;  %v3555_v7 = vld [vmem:[#allocation3 + $0x1f0] ss:$20 sps:$4 sm:$0xff]  }
 0x2a2   :  { %1360 = vmatprep.subr.bf16.mxu0 %v3497_v8  ;;  %1446 = vmatprep.subr.bf16.mxu1 %v3500_v9  ;;  %v3556_v8 = vld [vmem:[#allocation3 + $0xb0] ss:$20 sps:$4 sm:$0xff]  }
 0x2a3   :  { %v3557_v9 = vld [vmem:[#allocation3 + $0x330] ss:$20 sps:$4 sm:$0xff]  }
 0x2a5   :  { %1361 = vmatpush1.bf16.msra.mxu0 %v3495_v43  ;;  %1447 = vmatpush1.bf16.msra.mxu1 %v3498_v10  ;;  %v3558_v43 = vld [vmem:[#allocation3 + $0x218] ss:$20 sps:$4 sm:$0xff]  }
 0x2a6   :  { %1362 = vmatprep.subr.bf16.mxu0 %v3503_v34  ;;  %1448 = vmatprep.subr.bf16.mxu1 %v3506_v12  ;;  %v3559_v10 = vld [vmem:[#allocation3 + $0xd8] ss:$20 sps:$4 sm:$0xff]   ;;  %v3561_v12 = vld [vmem:[#allocation3 + $0x240] ss:$20 sps:$4 sm:$0xff]  }
 0x2a7   :  { %v3560_v34 = vld [vmem:[#allocation3 + $0x358] ss:$20 sps:$4 sm:$0xff]  }
 0x2a9   :  { %1363 = vmatpush1.bf16.msra.mxu0 %v3501_v11  ;;  %1449 = vmatpush1.bf16.msra.mxu1 %v3504_v13  ;;  %v481_v16 = vpop.f32.mrb[0].mxu1  ;;  %v3562_v11 = vld [vmem:[#allocation3 + $0x100] ss:$20 sps:$4 sm:$0xff]  }
 0x2aa   :  { %v482_v18 = vadd.f32 %v481_v16, %v338_v50  ;;  %v483_v55 = vpop.f32.mrb[1].mxu1  ;;  %1364 = vmatprep.subr.bf16.mxu0 %v3509_v14  ;;  %1450 = vmatprep.subr.bf16.mxu1 %v3512_v15  ;;  %v3563_v13 = vld [vmem:[#allocation3 + $0x380] ss:$20 sps:$4 sm:$0xff]   ;;  %v3564_v14 = vld [vmem:[#allocation3 + $0x268] ss:$20 sps:$4 sm:$0xff]  }
 0x2ab   :  { %v484_v20 = vadd.f32 %v483_v55, %v338_v50  ;;  %v485_v21 = vpop.f32.mrb[2].mxu1  ;;  %v3541_v50 = vld [vmem:[#allocation3 + $0x3c0] ss:$20 sps:$4 sm:$0x3f]   ;;  %v3565_v15 = vld [vmem:[#allocation3 + $0x128] ss:$20 sps:$4 sm:$0xff]  }
 0x2ac   :  { %v486_v22 = vadd.f32 %v485_v21, %v343_v52  ;;  %v487_v23 = vpop.f32.mrb[3].mxu1  ;;  %v492_v27 = vmax.f32 %v482_v18, 0.0  ;;  %v3566_v16 = vld [vmem:[#allocation3 + $0x3a8] ss:$20 sps:$4 sm:$0xff]   ;;  %v3568_v18 = vld [vmem:[#allocation8] ss:$16 sps:$4 sm:$0xff]  }
 0x2ad   :  { %v488_v24 = vadd.f32 %v487_v23, %v343_v52  ;;  %1365 = vmatpush1.bf16.msra.mxu0 %v3507_v56  ;;  %1451 = vmatpush1.bf16.msra.mxu1 %v3510_v17  ;;  %v493_v32 = vmax.f32 %v484_v20, 0.0  ;;  %v1301_v52 = vsel %vm309_vm8, %v3541_v50, 0  ;;  %v3570_v56 = vld [vmem:[#allocation8 + $0x4] ss:$16 sps:$4 sm:$0xff]   ;;  %v3574_v20 = vld [vmem:[#allocation8 + $0x20] ss:$16 sps:$4 sm:$0xff]  }
 0x2ae   :  { %v496_v29 = vmax.f32 %v486_v22, 0.0  ;;  %1366 = vmatprep.subr.bf16.mxu0 %v3515_v19  ;;  %1452 = vmatprep.subr.bf16.mxu1 %v3518_v61  ;;  %v3567_v17 = vld [vmem:[#allocation3 + $0x3d0] ss:$20 sps:$4 sm:$0x3f]   ;;  %v3573_v61 = vld [vmem:[#allocation8 + $0xc] ss:$16 sps:$4 sm:$0xff]  }
 0x2af   :  { %v497_v33 = vmax.f32 %v488_v24, 0.0  ;;  %v3576_v55 = vld [vmem:[#allocation8 + $0x24] ss:$16 sps:$4 sm:$0xff]   ;;  %v1313_v19 = vsel %vm309_vm8, %v3567_v17, 0  ;;  %v3571_v21 = vld [vmem:[#allocation8 + $0x8] ss:$16 sps:$4 sm:$0xff]  }
 0x2b0   :  { %v4252_v35 = vpack.c.bf16 %v496_v29, %v492_v27  ;;  %v3582_v22 = vld [vmem:[#allocation8 + $0x44] ss:$16 sps:$4 sm:$0xff]   ;;  %v3579_v23 = vld [vmem:[#allocation8 + $0x2c] ss:$16 sps:$4 sm:$0xff]   ;;  %v3580_v24 = vld [vmem:[#allocation8 + $0x40] ss:$16 sps:$4 sm:$0xff]  }
 0x2b1   :  { %v501_v36 = vpack.c.bf16 %v497_v33, %v493_v32  ;;  %1367 = vmatpush1.bf16.msra.mxu0 %v3513_v25  ;;  %1453 = vmatpush1.bf16.msra.mxu1 %v3516_v26  ;;  %v3577_v25 = vld [vmem:[#allocation8 + $0x28] ss:$16 sps:$4 sm:$0xff]   ;;  %v3588_v26 = vld [vmem:[#allocation8 + $0x64] ss:$16 sps:$4 sm:$0xff]   ;;  %v3585_v27 = vld [vmem:[#allocation8 + $0x4c] ss:$16 sps:$4 sm:$0xff]  }
 0x2b2   :  { %1368 = vmatprep.subr.bf16.mxu0 %v3521_v30  ;;  %1454 = vmatprep.subr.bf16.mxu1 %v3524_v31  ;;  %v3583_v29 = vld [vmem:[#allocation8 + $0x48] ss:$16 sps:$4 sm:$0xff]   ;;  %v3594_v30 = vld [vmem:[#allocation8 + $0x84] ss:$16 sps:$4 sm:$0xff]   ;;  %v3591_v31 = vld [vmem:[#allocation8 + $0x6c] ss:$16 sps:$4 sm:$0xff]  }
 0x2b3   :  { %3153 = vmatprep.mubr.msk.bf16.mxu0 %vm109_vm0, %v501_v36  ;;  %3155 = vmatprep.mubr.msk.bf16.mxu1 %vm109_vm0, %v501_v36  ;;  %v3592_v32 = vld [vmem:[#allocation8 + $0x80] ss:$16 sps:$4 sm:$0xff]   ;;  %v3589_v33 = vld [vmem:[#allocation8 + $0x68] ss:$16 sps:$4 sm:$0xff]   ;;  %v3660_v17 = vld [vmem:[#allocation8 + $0x1e4] ss:$16 sps:$4 sm:$0xff]  }
 0x2b4   :  { %v3616_v50 = vld [vmem:[#allocation8 + $0x100] ss:$16 sps:$4 sm:$0xff]  }
 0x2b5   :  { %1369 = vmatpush1.bf16.msra.mxu0 %v3519_v37  ;;  %1455 = vmatpush1.bf16.msra.mxu1 %v3522_v38  ;;  %v3598_v37 = vld [vmem:[#allocation8 + $0xa0] ss:$16 sps:$4 sm:$0xff]   ;;  %v3595_v38 = vld [vmem:[#allocation8 + $0x88] ss:$16 sps:$4 sm:$0xff]  }
 0x2b6   :  { %1370 = vmatprep.subr.bf16.mxu0 %v3527_v39  ;;  %1456 = vmatprep.subr.bf16.mxu1 %v3530_v41  ;;  %v3606_v39 = vld [vmem:[#allocation8 + $0xc4] ss:$16 sps:$4 sm:$0xff]   ;;  %v3603_v41 = vld [vmem:[#allocation8 + $0xac] ss:$16 sps:$4 sm:$0xff]  }
 0x2b9   :  { %1371 = vmatpush1.bf16.msra.mxu0 %v3525_v42  ;;  %1457 = vmatpush1.bf16.msra.mxu1 %v3528_v28  ;;  %v3604_v42 = vld [vmem:[#allocation8 + $0xc0] ss:$16 sps:$4 sm:$0xff]   ;;  %v3601_v28 = vld [vmem:[#allocation8 + $0xa8] ss:$16 sps:$4 sm:$0xff]  }
 0x2ba   :  { %1372 = vmatprep.subr.bf16.mxu0 %v3533_v44  ;;  %1458 = vmatprep.subr.bf16.mxu1 %v3536_v45  ;;  %v3612_v44 = vld [vmem:[#allocation8 + $0xe4] ss:$16 sps:$4 sm:$0xff]   ;;  %v3609_v45 = vld [vmem:[#allocation8 + $0xcc] ss:$16 sps:$4 sm:$0xff]  }
 0x2bd   :  { %1373 = vmatpush1.bf16.msra.mxu0 %v3531_v46  ;;  %1459 = vmatpush1.bf16.msra.mxu1 %v3534_v47  ;;  %v3610_v46 = vld [vmem:[#allocation8 + $0xe0] ss:$16 sps:$4 sm:$0xff]   ;;  %v3607_v47 = vld [vmem:[#allocation8 + $0xc8] ss:$16 sps:$4 sm:$0xff]  }
 0x2be   :  { %3152 = vmatprep.subr.msk.bf16.mxu0 %vm309_vm8, %v3537_v48  ;;  %3154 = vmatprep.subr.msk.bf16.mxu1 %vm309_vm8, %v3539_v49  ;;  %v3618_v48 = vld [vmem:[#allocation8 + $0x104] ss:$16 sps:$4 sm:$0xff]   ;;  %v3615_v49 = vld [vmem:[#allocation8 + $0xec] ss:$16 sps:$4 sm:$0xff]  }
 0x2c1   :  { %1375 = vmatpush1.bf16.msra.mxu0 %v1301_v52  ;;  %1461 = vmatpush1.bf16.msra.mxu1 %v1307_v53  ;;  %v3624_v52 = vld [vmem:[#allocation8 + $0x124] ss:$16 sps:$4 sm:$0xff]   ;;  %v3621_v53 = vld [vmem:[#allocation8 + $0x10c] ss:$16 sps:$4 sm:$0xff]  }
 0x2c2   :  { %3319 = vmatprep.subr.bf16.mxu0 %v3543_v54  ;;  %1528 = vmatprep.subr.bf16.mxu1 %v3924_v40  ;;  %v3622_v54 = vld [vmem:[#allocation8 + $0x120] ss:$16 sps:$4 sm:$0xff]  }
 0x2c4   :  { %1391 = vmatmul.mubr.bf16.vlgmr.msra.gmra.mrb[4].mxu0 %v4252_v35  ;;  %1477 = vmatmul.mubr.bf16.vlgmr.msra.gmra.mrb[4].mxu1 %v4252_v35 }
 0x2c5   :  { %3320 = vmatpush3.bf16.msra.mxu0 %v3544_v58  ;;  %1519 = vmatprep.mubr.bf16.mxu0 %v4246_v5  ;;  %v3554_v5 = vld [vmem:[#allocation3 + $0x308] ss:$20 sps:$4 sm:$0xff]  }
 0x2c6   :  { %1529 = vmatpush1.bf16.msra.mxu1 %v3545_v57  ;;  %3156 = vmatprep.mubr.msk.bf16.mxu1 %vm109_vm0, %v501_v36  ;;  %v3597_v36 = vld [vmem:[#allocation8 + $0x8c] ss:$16 sps:$4 sm:$0xff]   ;;  %v3619_v58 = vld [vmem:[#allocation8 + $0x108] ss:$16 sps:$4 sm:$0xff]   ;;  %vm1856_vm0 = vcmask 1041409  }
 0x2c7   :  { %3321 = vmatprep.subr.bf16.mxu0 %v3546_v59  ;;  %1530 = vmatprep.subr.bf16.mxu1 %v3924_v40  ;;  %v3627_v57 = vld [vmem:[#allocation8 + $0x12c] ss:$16 sps:$4 sm:$0xff]   ;;  %v3625_v59 = vld [vmem:[#allocation8 + $0x128] ss:$16 sps:$4 sm:$0xff]  }
 0x2c9   :  { %3322 = vmatpush3.bf16.msra.mxu0 %v3547_v60  ;;  %v3630_v60 = vld [vmem:[#allocation8 + $0x144] ss:$16 sps:$4 sm:$0xff]  }
 0x2ca   :  { %1531 = vmatpush1.bf16.msra.mxu1 %v3548_v62  ;;  %3323 = vmatprep.subr.bf16.mxu0 %v3549_v63  ;;  %v3633_v62 = vld [vmem:[#allocation8 + $0x14c] ss:$16 sps:$4 sm:$0xff]   ;;  %v3628_v63 = vld [vmem:[#allocation8 + $0x140] ss:$16 sps:$4 sm:$0xff]  }
 0x2cb   :  { %1532 = vmatprep.subr.bf16.mxu1 %v3924_v40 }
 0x2cd   :  { %3324 = vmatpush3.bf16.msra.mxu0 %v3550_v0  ;;  %v3631_v0 = vld [vmem:[#allocation8 + $0x148] ss:$16 sps:$4 sm:$0xff]  }
 0x2ce   :  { %1533 = vmatpush1.bf16.msra.mxu1 %v3551_v1  ;;  %3325 = vmatprep.subr.bf16.mxu0 %v3552_v2  ;;  %v3636_v1 = vld [vmem:[#allocation8 + $0x164] ss:$16 sps:$4 sm:$0xff]   ;;  %v3639_v2 = vld [vmem:[#allocation8 + $0x16c] ss:$16 sps:$4 sm:$0xff]  }
 0x2cf   :  { %1534 = vmatprep.subr.bf16.mxu1 %v3924_v40 }
 0x2d1   :  { %3326 = vmatpush3.bf16.msra.mxu0 %v3553_v6  ;;  %v3634_v6 = vld [vmem:[#allocation8 + $0x160] ss:$16 sps:$4 sm:$0xff]  }
 0x2d2   :  { %1535 = vmatpush1.bf16.msra.mxu1 %v3554_v5  ;;  %3327 = vmatprep.subr.bf16.mxu0 %v3555_v7  ;;  %v3637_v5 = vld [vmem:[#allocation8 + $0x168] ss:$16 sps:$4 sm:$0xff]   ;;  %v3642_v7 = vld [vmem:[#allocation8 + $0x184] ss:$16 sps:$4 sm:$0xff]  }
 0x2d3   :  { %1536 = vmatprep.subr.bf16.mxu1 %v3924_v40 }
 0x2d5   :  { %3328 = vmatpush3.bf16.msra.mxu0 %v3556_v8  ;;  %v3645_v8 = vld [vmem:[#allocation8 + $0x18c] ss:$16 sps:$4 sm:$0xff]  }
 0x2d6   :  { %1537 = vmatpush1.bf16.msra.mxu1 %v3557_v9  ;;  %3329 = vmatprep.subr.bf16.mxu0 %v3558_v43  ;;  %v3640_v9 = vld [vmem:[#allocation8 + $0x180] ss:$16 sps:$4 sm:$0xff]   ;;  %v3643_v43 = vld [vmem:[#allocation8 + $0x188] ss:$16 sps:$4 sm:$0xff]  }
 0x2d7   :  { %1538 = vmatprep.subr.bf16.mxu1 %v3924_v40 }
 0x2d9   :  { %3330 = vmatpush3.bf16.msra.mxu0 %v3559_v10  ;;  %v3648_v10 = vld [vmem:[#allocation8 + $0x1a4] ss:$16 sps:$4 sm:$0xff]  }
 0x2da   :  { %1539 = vmatpush1.bf16.msra.mxu1 %v3560_v34  ;;  %3331 = vmatprep.subr.bf16.mxu0 %v3561_v12  ;;  %v3651_v34 = vld [vmem:[#allocation8 + $0x1ac] ss:$16 sps:$4 sm:$0xff]   ;;  %v3646_v12 = vld [vmem:[#allocation8 + $0x1a0] ss:$16 sps:$4 sm:$0xff]  }
 0x2db   :  { %1540 = vmatprep.subr.bf16.mxu1 %v3924_v40 }
 0x2dd   :  { %3332 = vmatpush3.bf16.msra.mxu0 %v3562_v11  ;;  %v3649_v11 = vld [vmem:[#allocation8 + $0x1a8] ss:$16 sps:$4 sm:$0xff]  }
 0x2de   :  { %1541 = vmatpush1.bf16.msra.mxu1 %v3563_v13  ;;  %3333 = vmatprep.subr.bf16.mxu0 %v3564_v14  ;;  %v3654_v13 = vld [vmem:[#allocation8 + $0x1c4] ss:$16 sps:$4 sm:$0xff]   ;;  %v3657_v14 = vld [vmem:[#allocation8 + $0x1cc] ss:$16 sps:$4 sm:$0xff]  }
 0x2df   :  { %1542 = vmatprep.subr.bf16.mxu1 %v3924_v40 }
 0x2e1   :  { %3334 = vmatpush3.bf16.msra.mxu0 %v3565_v15  ;;  %v3652_v15 = vld [vmem:[#allocation8 + $0x1c0] ss:$16 sps:$4 sm:$0xff]  }
 0x2e2   :  { %1543 = vmatpush1.bf16.msra.mxu1 %v3566_v16  ;;  %2672 = vmatprep.subr.bf16.mxu0 %v3570_v56  ;;  %v3655_v16 = vld [vmem:[#allocation8 + $0x1c8] ss:$16 sps:$4 sm:$0xff]   ;;  %v3658_v56 = vld [vmem:[#allocation8 + $0x1e0] ss:$16 sps:$4 sm:$0xff]  }
 0x2e3   :  { %1544 = vmatprep.subr.bf16.mxu1 %v3924_v40 }
 0x2e4   :  { %1520 = vmatmul.mubr.bf16.vlgmr.msra.gmra.mrb[8].mxu0 %v4244_v3  ;;  %v3586_v3 = vld [vmem:[#allocation8 + $0x60] ss:$16 sps:$4 sm:$0xff]  }
 0x2e5   :  { %2673 = vmatpush1.bf16.msra.mxu0 %v3568_v18  ;;  %v3661_v18 = vld [vmem:[#allocation8 + $0x1e8] ss:$16 sps:$4 sm:$0xff]  }
 0x2e6   :  { %1545 = vmatpush1.bf16.msra.mxu1 %v1313_v19  ;;  %2674 = vmatprep.subr.bf16.mxu0 %v3576_v55  ;;  %v3663_v55 = vld [vmem:[#allocation8 + $0x1ec] ss:$16 sps:$4 sm:$0xff]   ;;  %v3666_v19 = vld [vmem:[#allocation8 + $0x204] ss:$16 sps:$4 sm:$0xff]  }
 0x2e7   :  { %2795 = vmatprep.subr.bf16.mxu1 %v3573_v61  ;;  %v3669_v61 = vld [vmem:[#allocation8 + $0x20c] ss:$16 sps:$4 sm:$0xff]  }
 0x2e9   :  { %1561 = vmatmul.mubr.bf16.vlgmr.msra.gmra.mrb[8].mxu1 %v4252_v35  ;;  %2675 = vmatpush1.bf16.msra.mxu0 %v3574_v20  ;;  %v3600_v35 = vld [vmem:[#allocation8 + $0xa4] ss:$16 sps:$4 sm:$0xff]   ;;  %v1569_v20 = vld [vmem:[#allocation6] sm:$0xff] }
 0x2ea   :  { %2796 = vmatpush1.bf16.msra.mxu1 %v3571_v21  ;;  %2676 = vmatprep.subr.bf16.mxu0 %v3582_v22  ;;  %v1571_v21 = vld [vmem:[#allocation6 + $0x10] sm:$0xff]  ;;  %v1570_v22 = vld [vmem:[#allocation6 + $0x8] sm:$0xff] }
 0x2eb   :  { %2797 = vmatprep.subr.bf16.mxu1 %v3579_v23  ;;  %v1572_v23 = vld [vmem:[#allocation6 + $0x18] sm:$0xff] }
 0x2ed   :  { %2677 = vmatpush1.bf16.msra.mxu0 %v3580_v24 }
 0x2ee   :  { %2798 = vmatpush1.bf16.msra.mxu1 %v3577_v25  ;;  %2678 = vmatprep.subr.bf16.mxu0 %v3588_v26 }
 0x2ef   :  { %2799 = vmatprep.subr.bf16.mxu1 %v3585_v27 }
 0x2f1   :  { %2679 = vmatpush1.bf16.msra.mxu0 %v3586_v3 }
 0x2f2   :  { %2800 = vmatpush1.bf16.msra.mxu1 %v3583_v29  ;;  %2680 = vmatprep.subr.bf16.mxu0 %v3594_v30 }
 0x2f3   :  { %2801 = vmatprep.subr.bf16.mxu1 %v3591_v31 }
 0x2f5   :  { %2681 = vmatpush1.bf16.msra.mxu0 %v3592_v32 }
 0x2f6   :  { %2802 = vmatpush1.bf16.msra.mxu1 %v3589_v33  ;;  %2682 = vmatprep.subr.bf16.mxu0 %v3600_v35 }
 0x2f7   :  { %2803 = vmatprep.subr.bf16.mxu1 %v3597_v36 }
 0x2f9   :  { %2683 = vmatpush1.bf16.msra.mxu0 %v3598_v37 }
 0x2fa   :  { %2804 = vmatpush1.bf16.msra.mxu1 %v3595_v38  ;;  %2684 = vmatprep.subr.bf16.mxu0 %v3606_v39 }
 0x2fb   :  { %2805 = vmatprep.subr.bf16.mxu1 %v3603_v41 }
 0x2fd   :  { %2685 = vmatpush1.bf16.msra.mxu0 %v3604_v42 }
 0x2fe   :  { %2806 = vmatpush1.bf16.msra.mxu1 %v3601_v28  ;;  %2686 = vmatprep.subr.bf16.mxu0 %v3612_v44 }
 0x2ff   :  { %2807 = vmatprep.subr.bf16.mxu1 %v3609_v45 }
 0x301   :  { %2687 = vmatpush1.bf16.msra.mxu0 %v3610_v46 }
 0x302   :  { %2808 = vmatpush1.bf16.msra.mxu1 %v3607_v47  ;;  %2688 = vmatprep.subr.bf16.mxu0 %v3618_v48 }
 0x303   :  { %2809 = vmatprep.subr.bf16.mxu1 %v3615_v49 }
 0x305   :  { %2689 = vmatpush1.bf16.msra.mxu0 %v3616_v50 }
 0x306   :  { %2810 = vmatpush1.bf16.msra.mxu1 %v3613_v51  ;;  %2690 = vmatprep.subr.bf16.mxu0 %v3624_v52 }
 0x307   :  { %2811 = vmatprep.subr.bf16.mxu1 %v3621_v53 }
 0x309   :  { %2691 = vmatpush1.bf16.msra.mxu0 %v3622_v54 }
 0x30a   :  { %2812 = vmatpush1.bf16.msra.mxu1 %v3619_v58  ;;  %2692 = vmatprep.subr.bf16.mxu0 %v3630_v60 }
 0x30b   :  { %2813 = vmatprep.subr.bf16.mxu1 %v3627_v57 }
 0x30d   :  { %2693 = vmatpush1.bf16.msra.mxu0 %v3628_v63 }
 0x30e   :  { %2814 = vmatpush1.bf16.msra.mxu1 %v3625_v59  ;;  %2694 = vmatprep.subr.bf16.mxu0 %v3636_v1 }
 0x30f   :  { %2815 = vmatprep.subr.bf16.mxu1 %v3633_v62 }
 0x311   :  { %2695 = vmatpush1.bf16.msra.mxu0 %v3634_v6 }
 0x312   :  { %2816 = vmatpush1.bf16.msra.mxu1 %v3631_v0  ;;  %2696 = vmatprep.subr.bf16.mxu0 %v3642_v7 }
 0x313   :  { %2817 = vmatprep.subr.bf16.mxu1 %v3639_v2 }
 0x315   :  { %2697 = vmatpush1.bf16.msra.mxu0 %v3640_v9 }
 0x316   :  { %2818 = vmatpush1.bf16.msra.mxu1 %v3637_v5  ;;  %2698 = vmatprep.subr.bf16.mxu0 %v3648_v10 }
 0x317   :  { %2819 = vmatprep.subr.bf16.mxu1 %v3645_v8 }
 0x319   :  { %2699 = vmatpush1.bf16.msra.mxu0 %v3646_v12 }
 0x31a   :  { %2820 = vmatpush1.bf16.msra.mxu1 %v3643_v43  ;;  %2700 = vmatprep.subr.bf16.mxu0 %v3654_v13 }
 0x31b   :  { %2821 = vmatprep.subr.bf16.mxu1 %v3651_v34 }
 0x31d   :  { %2701 = vmatpush1.bf16.msra.mxu0 %v3652_v15 }
 0x31e   :  { %2822 = vmatpush1.bf16.msra.mxu1 %v3649_v11  ;;  %2702 = vmatprep.subr.bf16.mxu0 %v3660_v17 }
 0x31f   :  { %2823 = vmatprep.subr.bf16.mxu1 %v3657_v14 }
 0x321   :  { %2703 = vmatpush1.bf16.msra.mxu0 %v3658_v56 }
 0x322   :  { %2824 = vmatpush1.bf16.msra.mxu1 %v3655_v16  ;;  %2713 = vmatprep.subr.bf16.mxu0 %v3666_v19 }
 0x323   :  { %2825 = vmatprep.subr.bf16.mxu1 %v3663_v55 }
 0x326   :  { %2826 = vmatpush1.bf16.msra.mxu1 %v3661_v18 }
 0x327   :  { %2836 = vmatprep.subr.bf16.mxu1 %v3669_v61 }
 0x397   :  { %v1392_v24 = vpop.f32.mrb[4].mxu0  ;;  %v1478_v25 = vpop.f32.mrb[4].mxu1 }
 0x398   :  { %v1574_v26 = vmul.f32 %v1569_v20, %v1392_v24  ;;  %v1576_v27 = vmul.f32 %v1571_v21, %v1478_v25  ;;  %v1394_v3 = vpop.f32.mrb[5].mxu0  ;;  %v1480_v29 = vpop.f32.mrb[5].mxu1 }
 0x399   :  { %v1575_v30 = vmul.f32 %v1570_v22, %v1394_v3  ;;  %v1577_v31 = vmul.f32 %v1572_v23, %v1480_v29  ;;  %v1396_v32 = vpop.f32.mrb[6].mxu0  ;;  %v1482_v33 = vpop.f32.mrb[6].mxu1 }
 0x39a   :  { %v1584_v35 = vrot.slane %v1574_v26, 4  ;;  %v1596_v36 = vrot.slane %v1576_v27, 4  ;;  %v1579_v37 = vmul.f32 %v1569_v20, %v1396_v32  ;;  %v1581_v38 = vmul.f32 %v1571_v21, %v1482_v33  ;;  %v1398_v39 = vpop.f32.mrb[7].mxu0  ;;  %v1484_v41 = vpop.f32.mrb[7].mxu1 }
 0x39b   :  { %v1590_v42 = vrot.slane %v1575_v30, 4  ;;  %v1602_v28 = vrot.slane %v1577_v31, 4  ;;  %v1580_v44 = vmul.f32 %v1570_v22, %v1398_v39  ;;  %v1582_v45 = vmul.f32 %v1572_v23, %v1484_v41 }
 0x39c   :  { %v1585_v46 = vadd.f32 %v1584_v35, %v1574_v26  ;;  %v1597_v47 = vadd.f32 %v1596_v36, %v1576_v27  ;;  %v1614_v48 = vrot.slane %v1579_v37, 4  ;;  %v1626_v49 = vrot.slane %v1581_v38, 4 }
 0x39d   :  { %v1591_v50 = vadd.f32 %v1590_v42, %v1575_v30  ;;  %v1603_v51 = vadd.f32 %v1602_v28, %v1577_v31  ;;  %v1620_v52 = vrot.slane %v1580_v44, 4  ;;  %v1632_v53 = vrot.slane %v1582_v45, 4 }
 0x39e   :  { %v1586_v54 = vrot.slane %v1585_v46, 2  ;;  %v1598_v58 = vrot.slane %v1597_v47, 2  ;;  %v1615_v57 = vadd.f32 %v1614_v48, %v1579_v37  ;;  %v1627_v59 = vadd.f32 %v1626_v49, %v1581_v38  ;;  %v3664_v49 = vld [vmem:[#allocation8 + $0x200] ss:$16 sps:$4 sm:$0xff]  }
 0x39f   :  { %v1592_v60 = vrot.slane %v1591_v50, 2  ;;  %v1604_v62 = vrot.slane %v1603_v51, 2  ;;  %v1621_v63 = vadd.f32 %v1620_v52, %v1580_v44  ;;  %v1633_v0 = vadd.f32 %v1632_v53, %v1582_v45  ;;  %v3672_v52 = vld [vmem:[#allocation8 + $0x224] ss:$16 sps:$4 sm:$0xff]   ;;  %v3675_v53 = vld [vmem:[#allocation8 + $0x22c] ss:$16 sps:$4 sm:$0xff]  }
 0x3a0   :  { %v1587_v1 = vadd.f32 %v1586_v54, %v1585_v46  ;;  %v1599_v2 = vadd.f32 %v1598_v58, %v1597_v47  ;;  %v1616_v6 = vrot.slane %v1615_v57, 2  ;;  %v1628_v5 = vrot.slane %v1627_v59, 2  ;;  %v3670_v58 = vld [vmem:[#allocation8 + $0x220] ss:$16 sps:$4 sm:$0xff]  }
 0x3a1   :  { %v1593_v7 = vadd.f32 %v1592_v60, %v1591_v50  ;;  %v1605_v8 = vadd.f32 %v1604_v62, %v1603_v51  ;;  %v1622_v9 = vrot.slane %v1621_v63, 2  ;;  %v1634_v43 = vrot.slane %v1633_v0, 2  ;;  %v3667_v50 = vld [vmem:[#allocation8 + $0x208] ss:$16 sps:$4 sm:$0xff]   ;;  %v3681_v60 = vld [vmem:[#allocation8 + $0x24c] ss:$16 sps:$4 sm:$0xff]  }
 0x3a2   :  { %v1588_v10 = vrot.slane %v1587_v1, 1  ;;  %v1600_v34 = vrot.slane %v1599_v2, 1  ;;  %v1617_v12 = vadd.f32 %v1616_v6, %v1615_v57  ;;  %v1629_v11 = vadd.f32 %v1628_v5, %v1627_v59  ;;  %v3673_v57 = vld [vmem:[#allocation8 + $0x228] ss:$16 sps:$4 sm:$0xff]   ;;  %v3678_v59 = vld [vmem:[#allocation8 + $0x244] ss:$16 sps:$4 sm:$0xff]  }
 0x3a3   :  { %v1594_v13 = vrot.slane %v1593_v7, 1  ;;  %v1606_v14 = vrot.slane %v1605_v8, 1  ;;  %v1623_v15 = vadd.f32 %v1622_v9, %v1621_v63  ;;  %v1635_v16 = vadd.f32 %v1634_v43, %v1633_v0  ;;  %v3676_v62 = vld [vmem:[#allocation8 + $0x240] ss:$16 sps:$4 sm:$0xff]   ;;  %v3679_v63 = vld [vmem:[#allocation8 + $0x248] ss:$16 sps:$4 sm:$0xff]  }
 0x3a4   :  { %v1589_v56 = vadd.f32 %v1588_v10, %v1587_v1  ;;  %v1601_v17 = vadd.f32 %v1600_v34, %v1599_v2  ;;  %v1618_v18 = vrot.slane %v1617_v12, 1  ;;  %v1630_v55 = vrot.slane %v1629_v11, 1  ;;  %v3684_v1 = vld [vmem:[#allocation8 + $0x264] ss:$16 sps:$4 sm:$0xff]   ;;  %v3687_v2 = vld [vmem:[#allocation8 + $0x26c] ss:$16 sps:$4 sm:$0xff]  }
 0x3a5   :  { %v1595_v19 = vadd.f32 %v1594_v13, %v1593_v7  ;;  %v1607_v61 = vadd.f32 %v1606_v14, %v1605_v8  ;;  %v1624_v20 = vrot.slane %v1623_v15, 1  ;;  %v1636_v21 = vrot.slane %v1635_v16, 1  ;;  %v3682_v9 = vld [vmem:[#allocation8 + $0x260] ss:$16 sps:$4 sm:$0xff]   ;;  %v3685_v43 = vld [vmem:[#allocation8 + $0x268] ss:$16 sps:$4 sm:$0xff]  }
 0x3a6   :  { %v1644_v22 = vpack.c.bf16 %v1589_v56, %v1589_v56  ;;  %v1646_v23 = vpack.c.bf16 %v1601_v17, %v1601_v17  ;;  %v1619_v24 = vadd.f32 %v1618_v18, %v1617_v12  ;;  %v1631_v25 = vadd.f32 %v1630_v55, %v1629_v11  ;;  %v3690_v34 = vld [vmem:[#allocation8 + $0x284] ss:$16 sps:$4 sm:$0xff]   ;;  %v3693_v12 = vld [vmem:[#allocation8 + $0x28c] ss:$16 sps:$4 sm:$0xff]   ;;  %v3688_v56 = vld [vmem:[#allocation8 + $0x280] ss:$16 sps:$4 sm:$0xff]  }
 0x3a7   :  { %v1645_v26 = vpack.c.bf16 %v1595_v19, %v1595_v19  ;;  %v1647_v27 = vpack.c.bf16 %v1607_v61, %v1607_v61  ;;  %v1625_v3 = vadd.f32 %v1624_v20, %v1623_v15  ;;  %v1637_v29 = vadd.f32 %v1636_v21, %v1635_v16  ;;  %v1573_v13 = vld [vmem:[#allocation6 + $0x20] sm:$0xff]  ;;  %v3696_v61 = vld [vmem:[#allocation8 + $0x2a4] ss:$16 sps:$4 sm:$0xff]  }
 0x3a8   :  { %v1649_v30 = vpack.c.bf16 %v1619_v24, %v1619_v24  ;;  %v1651_v31 = vpack.c.bf16 %v1631_v25, %v1631_v25  ;;  %v1846_v35 = vunpack.c.l.b16 %v1644_v22  ;;  %v1848_v36 = vunpack.c.l.b16 %v1646_v23  ;;  %v3691_v17 = vld [vmem:[#allocation8 + $0x288] ss:$16 sps:$4 sm:$0xff]   ;;  %v3699_v20 = vld [vmem:[#allocation8 + $0x2ac] ss:$16 sps:$4 sm:$0xff]   ;;  %v3694_v23 = vld [vmem:[#allocation8 + $0x2a0] ss:$16 sps:$4 sm:$0xff]  }
 0x3a9   :  { %v1650_v32 = vpack.c.bf16 %v1625_v3, %v1625_v3  ;;  %v1652_v33 = vpack.c.bf16 %v1637_v29, %v1637_v29  ;;  %v1847_v39 = vunpack.c.l.b16 %v1645_v26  ;;  %v1849_v41 = vunpack.c.l.b16 %v1647_v27  ;;  %v3697_v24 = vld [vmem:[#allocation8 + $0x2a8] ss:$16 sps:$4 sm:$0xff]   ;;  %v3702_v27 = vld [vmem:[#allocation8 + $0x2c4] ss:$16 sps:$4 sm:$0xff]   ;;  %v3705_v3 = vld [vmem:[#allocation8 + $0x2cc] ss:$16 sps:$4 sm:$0xff]  }
 0x3aa   :  { %v1851_v37 = vunpack.c.l.b16 %v1649_v30  ;;  %v1853_v38 = vunpack.c.l.b16 %v1651_v31  ;;  %v3700_v31 = vld [vmem:[#allocation8 + $0x2c0] ss:$16 sps:$4 sm:$0xff]  }
 0x3ab   :  { %v1852_v42 = vunpack.c.l.b16 %v1650_v32  ;;  %v1854_v28 = vunpack.c.l.b16 %v1652_v33  ;;  %v3703_v32 = vld [vmem:[#allocation8 + $0x2c8] ss:$16 sps:$4 sm:$0xff]  }
 0x3ac   :  { %v1857_v44 = vsel %vm1856_vm0, %v1851_v37, %v1846_v35  ;;  %v4278_v45 = vsel %vm1856_vm0, %v1853_v38, %v1848_v36  ;;  %v3708_v36 = vld [vmem:[#allocation8 + $0x2e4] ss:$16 sps:$4 sm:$0xff]   ;;  %v3711_v37 = vld [vmem:[#allocation8 + $0x2ec] ss:$16 sps:$4 sm:$0xff]  }
 0x3ad   :  { %v1858_v46 = vsel %vm1856_vm0, %v1852_v42, %v1847_v39  ;;  %v1860_v47 = vsel %vm1856_vm0, %v1854_v28, %v1849_v41  ;;  %v1862_v51 = vpack.c.b16 %v1857_v44, %v1857_v44  ;;  %v3706_v41 = vld [vmem:[#allocation8 + $0x2e0] ss:$16 sps:$4 sm:$0xff]   ;;  %v3709_v42 = vld [vmem:[#allocation8 + $0x2e8] ss:$16 sps:$4 sm:$0xff]  }
 0x3ae   :  { %v1863_v48 = vpack.c.b16 %v1858_v46, %v1858_v46  ;;  %v1865_v54 = vpack.c.b16 %v1860_v47, %v1860_v47  ;;  %v3714_v46 = vld [vmem:[#allocation8 + $0x304] ss:$16 sps:$4 sm:$0xff]   ;;  %v3717_v47 = vld [vmem:[#allocation8 + $0x30c] ss:$16 sps:$4 sm:$0xff]  }
 0x3b0   :  { %2704 = vmatprep.mubr.bf16.mxu0 %v1863_v48  ;;  %2827 = vmatprep.mubr.bf16.mxu1 %v1863_v48 }
 0x3b1   :  { %2705 = vmatmul.mubr.bf16.vlgmr.msra.gmra.mrb[12].mxu0 %v1862_v51  ;;  %2828 = vmatmul.mubr.bf16.vlgmr.msra.gmra.mrb[12].mxu1 %v1862_v51  ;;  %v3715_v51 = vld [vmem:[#allocation8 + $0x308] ss:$16 sps:$4 sm:$0xff]  }
 0x3b2   :  { %2714 = vmatpush1.bf16.msra.mxu0 %v3664_v49  ;;  %2837 = vmatpush1.bf16.msra.mxu1 %v3667_v50  ;;  %v3712_v50 = vld [vmem:[#allocation8 + $0x300] ss:$16 sps:$4 sm:$0xff]  }
 0x3b3   :  { %2745 = vmatprep.mubr.bf16.mxu0 %v1865_v54  ;;  %2868 = vmatprep.mubr.bf16.mxu1 %v1865_v54  ;;  %v3723_v54 = vld [vmem:[#allocation8 + $0x32c] ss:$16 sps:$4 sm:$0xff]  }
 0x3b4   :  { %2715 = vmatprep.subr.bf16.mxu0 %v3672_v52  ;;  %2838 = vmatprep.subr.bf16.mxu1 %v3675_v53  ;;  %v3720_v53 = vld [vmem:[#allocation8 + $0x324] ss:$16 sps:$4 sm:$0xff]  }
 0x3b6   :  { %2716 = vmatpush1.bf16.msra.mxu0 %v3670_v58  ;;  %2839 = vmatpush1.bf16.msra.mxu1 %v3673_v57 }
 0x3b7   :  { %v3335_v0 = vpop.f32.mrb[8].mxu0  ;;  %2717 = vmatprep.subr.bf16.mxu0 %v3678_v59  ;;  %2840 = vmatprep.subr.bf16.mxu1 %v3681_v60  ;;  %v3718_v59 = vld [vmem:[#allocation8 + $0x320] ss:$16 sps:$4 sm:$0xff]   ;;  %v3721_v60 = vld [vmem:[#allocation8 + $0x328] ss:$16 sps:$4 sm:$0xff]  }
 0x3b8   :  { %v3336_v6 = vpop.f32.mrb[9].mxu0 }
 0x3b9   :  { %v3337_v5 = vadd.f32 %v3336_v6, %v3335_v0  ;;  %v3338_v7 = vpop.f32.mrb[10].mxu0  ;;  %v3732_v6 = vld [vmem:[#allocation8 + $0x364] ss:$16 sps:$4 sm:$0xff]  }
 0x3ba   :  { %2718 = vmatpush1.bf16.msra.mxu0 %v3676_v62  ;;  %2841 = vmatpush1.bf16.msra.mxu1 %v3679_v63  ;;  %v3339_v8 = vpop.f32.mrb[11].mxu0  ;;  %v3726_v62 = vld [vmem:[#allocation8 + $0x344] ss:$16 sps:$4 sm:$0xff]   ;;  %v3729_v63 = vld [vmem:[#allocation8 + $0x34c] ss:$16 sps:$4 sm:$0xff]  }
 0x3bb   :  { %v3340_v10 = vadd.f32 %v3339_v8, %v3338_v7  ;;  %2719 = vmatprep.subr.bf16.mxu0 %v3684_v1  ;;  %2842 = vmatprep.subr.bf16.mxu1 %v3687_v2  ;;  %v3724_v1 = vld [vmem:[#allocation8 + $0x340] ss:$16 sps:$4 sm:$0xff]   ;;  %v3727_v2 = vld [vmem:[#allocation8 + $0x348] ss:$16 sps:$4 sm:$0xff]  }
 0x3bc   :  { %v1562_v11 = vpop.f32.mrb[8].mxu1  ;;  %v3730_v7 = vld [vmem:[#allocation8 + $0x360] ss:$16 sps:$4 sm:$0xff]   ;;  %v3733_v8 = vld [vmem:[#allocation8 + $0x368] ss:$16 sps:$4 sm:$0xff]  }
 0x3bd   :  { %v1563_v14 = vadd.f32 %v3337_v5, %v1562_v11  ;;  %v1564_v15 = vpop.f32.mrb[9].mxu1  ;;  %v3735_v5 = vld [vmem:[#allocation8 + $0x36c] ss:$16 sps:$4 sm:$0xff]  }
 0x3be   :  { %v1565_v16 = vpop.f32.mrb[10].mxu1  ;;  %2720 = vmatpush1.bf16.msra.mxu0 %v3682_v9  ;;  %2843 = vmatpush1.bf16.msra.mxu1 %v3685_v43  ;;  %v3738_v9 = vld [vmem:[#allocation8 + $0x384] ss:$16 sps:$4 sm:$0xff]   ;;  %v3741_v43 = vld [vmem:[#allocation8 + $0x38c] ss:$16 sps:$4 sm:$0xff]  }
 0x3bf   :  { %v1578_v18 = vmul.f32 %v1573_v13, %v1563_v14  ;;  %v1566_v55 = vadd.f32 %v3340_v10, %v1565_v16  ;;  %v1567_v19 = vpop.f32.mrb[11].mxu1  ;;  %2721 = vmatprep.subr.bf16.mxu0 %v3690_v34  ;;  %2844 = vmatprep.subr.bf16.mxu1 %v3693_v12  ;;  %v3736_v10 = vld [vmem:[#allocation8 + $0x380] ss:$16 sps:$4 sm:$0xff]   ;;  %v3739_v34 = vld [vmem:[#allocation8 + $0x388] ss:$16 sps:$4 sm:$0xff]  }
 0x3c0   :  { %v3744_v12 = vld [vmem:[#allocation8 + $0x3a4] ss:$16 sps:$4 sm:$0xff]   ;;  %v3747_v11 = vld [vmem:[#allocation8 + $0x3ac] ss:$16 sps:$4 sm:$0xff]   ;;  %v3745_v14 = vld [vmem:[#allocation8 + $0x3a8] ss:$16 sps:$4 sm:$0xff]  }
 0x3c1   :  { %v1608_v21 = vrot.slane %v1578_v18, 4  ;;  %v1583_v22 = vmul.f32 %v1573_v13, %v1566_v55  ;;  %v3742_v13 = vld [vmem:[#allocation8 + $0x3a0] ss:$16 sps:$4 sm:$0xff]   ;;  %v3750_v15 = vld [vmem:[#allocation8 + $0x3c4] ss:$16 sps:$4 sm:$0xff]  }
 0x3c2   :  { %2722 = vmatpush1.bf16.msra.mxu0 %v3688_v56  ;;  %2845 = vmatpush1.bf16.msra.mxu1 %v3691_v17  ;;  %v3753_v16 = vld [vmem:[#allocation8 + $0x3cc] ss:$16 sps:$4 sm:$0xff]   ;;  %v3748_v56 = vld [vmem:[#allocation8 + $0x3c0] ss:$16 sps:$4 sm:$0xff]   ;;  %v3751_v17 = vld [vmem:[#allocation8 + $0x3c8] ss:$16 sps:$4 sm:$0xff]  }
 0x3c3   :  { %v1609_v25 = vadd.f32 %v1608_v21, %v1578_v18  ;;  %v1638_v26 = vrot.slane %v1583_v22, 4  ;;  %2723 = vmatprep.subr.bf16.mxu0 %v3696_v61  ;;  %2846 = vmatprep.subr.bf16.mxu1 %v3699_v20  ;;  %v3756_v18 = vld [vmem:[#allocation8 + $0x3e4] ss:$16 sps:$4 sm:$0xff]   ;;  %v3759_v55 = vld [vmem:[#allocation8 + $0x3ec] ss:$16 sps:$4 sm:$0xff]  }
 0x3c4   :  { %v3754_v19 = vld [vmem:[#allocation8 + $0x3e0] ss:$16 sps:$4 sm:$0xff]   ;;  %v3757_v61 = vld [vmem:[#allocation8 + $0x3e8] ss:$16 sps:$4 sm:$0xff]   ;;  %v3762_v20 = vld [vmem:[#allocation8 + $0x404] ss:$16 sps:$4 sm:$0xff]  }
 0x3c5   :  { %v1610_v29 = vrot.slane %v1609_v25, 2  ;;  %v1639_v30 = vadd.f32 %v1638_v26, %v1583_v22  ;;  %v3765_v21 = vld [vmem:[#allocation8 + $0x40c] ss:$16 sps:$4 sm:$0xff]   ;;  %v3760_v22 = vld [vmem:[#allocation8 + $0x400] ss:$16 sps:$4 sm:$0xff]  }
 0x3c6   :  { %2724 = vmatpush1.bf16.msra.mxu0 %v3694_v23  ;;  %2847 = vmatpush1.bf16.msra.mxu1 %v3697_v24  ;;  %v3763_v23 = vld [vmem:[#allocation8 + $0x408] ss:$16 sps:$4 sm:$0xff]   ;;  %v1864_v24 = vpack.c.b16 %v4278_v45, %v4278_v45  ;;  %v3771_v26 = vld [vmem:[#allocation8 + $0x42c] ss:$16 sps:$4 sm:$0xff]   ;;  %v3772_v45 = vld [vmem:[#allocation8 + $0x440] ss:$16 sps:$4 sm:$0xff]  }
 0x3c7   :  { %v1611_v33 = vadd.f32 %v1610_v29, %v1609_v25  ;;  %v1640_v35 = vrot.slane %v1639_v30, 2  ;;  %2725 = vmatprep.subr.bf16.mxu0 %v3702_v27  ;;  %2848 = vmatprep.subr.bf16.mxu1 %v3705_v3  ;;  %v3768_v25 = vld [vmem:[#allocation8 + $0x424] ss:$16 sps:$4 sm:$0xff]   ;;  %v3766_v27 = vld [vmem:[#allocation8 + $0x420] ss:$16 sps:$4 sm:$0xff]  }
 0x3c8   :  { %v3769_v3 = vld [vmem:[#allocation8 + $0x428] ss:$16 sps:$4 sm:$0xff]   ;;  %v3774_v29 = vld [vmem:[#allocation8 + $0x444] ss:$16 sps:$4 sm:$0xff]  }
 0x3c9   :  { %v1612_v38 = vrot.slane %v1611_v33, 1  ;;  %v1641_v39 = vadd.f32 %v1640_v35, %v1639_v30  ;;  %v3777_v30 = vld [vmem:[#allocation8 + $0x44c] ss:$16 sps:$4 sm:$0xff]   ;;  %v3778_v35 = vld [vmem:[#allocation8 + $0x460] ss:$16 sps:$4 sm:$0xff]  }
 0x3ca   :  { %2726 = vmatpush1.bf16.msra.mxu0 %v3700_v31  ;;  %2849 = vmatpush1.bf16.msra.mxu1 %v3703_v32  ;;  %v3775_v31 = vld [vmem:[#allocation8 + $0x448] ss:$16 sps:$4 sm:$0xff]   ;;  %v3780_v32 = vld [vmem:[#allocation8 + $0x464] ss:$16 sps:$4 sm:$0xff]  }
 0x3cb   :  { %v1613_v28 = vadd.f32 %v1612_v38, %v1611_v33  ;;  %v1642_v44 = vrot.slane %v1641_v39, 1  ;;  %2727 = vmatprep.subr.bf16.mxu0 %v3708_v36  ;;  %2850 = vmatprep.subr.bf16.mxu1 %v3711_v37  ;;  %v3783_v33 = vld [vmem:[#allocation8 + $0x46c] ss:$16 sps:$4 sm:$0xff]   ;;  %v3781_v36 = vld [vmem:[#allocation8 + $0x468] ss:$16 sps:$4 sm:$0xff]  }
 0x3cc   :  { %v3786_v37 = vld [vmem:[#allocation8 + $0x484] ss:$16 sps:$4 sm:$0xff]   ;;  %v3789_v38 = vld [vmem:[#allocation8 + $0x48c] ss:$16 sps:$4 sm:$0xff]  }
 0x3cd   :  { %v1648_v48 = vpack.c.bf16 %v1613_v28, %v1613_v28  ;;  %v1643_v49 = vadd.f32 %v1642_v44, %v1641_v39  ;;  %v3784_v39 = vld [vmem:[#allocation8 + $0x480] ss:$16 sps:$4 sm:$0xff]   ;;  %v3793_v44 = vld [vmem:[#allocation8 + $0x4a8] ss:$16 sps:$4 sm:$0xff]  }
 0x3ce   :  { %2728 = vmatpush1.bf16.msra.mxu0 %v3706_v41  ;;  %2851 = vmatpush1.bf16.msra.mxu1 %v3709_v42  ;;  %v3792_v41 = vld [vmem:[#allocation8 + $0x4a4] ss:$16 sps:$4 sm:$0xff]   ;;  %v3795_v42 = vld [vmem:[#allocation8 + $0x4ac] ss:$16 sps:$4 sm:$0xff]   ;;  %v3790_v28 = vld [vmem:[#allocation8 + $0x4a0] ss:$16 sps:$4 sm:$0xff]  }
 0x3cf   :  { %v1653_v52 = vpack.c.bf16 %v1643_v49, %v1643_v49  ;;  %2729 = vmatprep.subr.bf16.mxu0 %v3714_v46  ;;  %2852 = vmatprep.subr.bf16.mxu1 %v3717_v47  ;;  %v1850_v58 = vunpack.c.l.b16 %v1648_v48  ;;  %v3798_v46 = vld [vmem:[#allocation8 + $0x4c4] ss:$16 sps:$4 sm:$0xff]   ;;  %v3801_v47 = vld [vmem:[#allocation8 + $0x4cc] ss:$16 sps:$4 sm:$0xff]   ;;  %v3796_v48 = vld [vmem:[#allocation8 + $0x4c0] ss:$16 sps:$4 sm:$0xff]  }
 0x3d0   :  { %v3799_v49 = vld [vmem:[#allocation8 + $0x4c8] ss:$16 sps:$4 sm:$0xff]  }
 0x3d1   :  { %v1855_v57 = vunpack.c.l.b16 %v1653_v52  ;;  %v3802_v52 = vld [vmem:[#allocation8 + $0x4e0] ss:$16 sps:$4 sm:$0xff]  }
 0x3d2   :  { %2730 = vmatpush1.bf16.msra.mxu0 %v3712_v50  ;;  %2853 = vmatpush1.bf16.msra.mxu1 %v3715_v51  ;;  %v3804_v50 = vld [vmem:[#allocation8 + $0x4e4] ss:$16 sps:$4 sm:$0xff]   ;;  %v3807_v51 = vld [vmem:[#allocation8 + $0x4ec] ss:$16 sps:$4 sm:$0xff]  }
 0x3d3   :  { %2731 = vmatprep.subr.bf16.mxu0 %v3720_v53  ;;  %2854 = vmatprep.subr.bf16.mxu1 %v3723_v54  ;;  %v4283_v0 = vsel %vm1856_vm0, %v1855_v57, %v1850_v58  ;;  %v3805_v53 = vld [vmem:[#allocation8 + $0x4e8] ss:$16 sps:$4 sm:$0xff]   ;;  %v1818_v58 = vsub.s32 0, %v4022_v4  ;;  %v1826_v57 = vsub.s32 2, %v4022_v4 }
 0x3d4   :  { %v1866_v54 = vpack.c.b16 %v4283_v0, %v4283_v0  ;;  %v2922_v0 = vld [vmem:[%s4324_s7] sm:$0xf] }
 0x3d6   :  { %2732 = vmatpush1.bf16.msra.mxu0 %v3718_v59  ;;  %2855 = vmatpush1.bf16.msra.mxu1 %v3721_v60  ;;  %v1814_v59 = vld [vmem:[%s4323_s6] sm:$0xf]  ;;  %v1822_v60 = vsub.s32 1, %v4022_v4  ;;  %s3925_s6 = smov [#allocation9]  }
 0x3d7   :  { %2733 = vmatprep.subr.bf16.mxu0 %v3726_v62  ;;  %2856 = vmatprep.subr.bf16.mxu1 %v3729_v63  ;;  %v1830_v62 = vsub.s32 3, %v4022_v4  ;;  %v1819_v63 = vrot.slane %v1814_v59, %v1818_v58  ;;  %s3011_s7 = sshll.u32 %s3925_s6, 4  ;;  %s3012_s7 = int_to_ptr.vmem [resolvable:$true] %s3011_s7 }
 0x3d8   :  { %s3878_s22 = scalar_lea.vmem %s3012_s7, 16  ;;  %s3882_s23 = scalar_lea.vmem %s3012_s7, 32 }
 0x3d9   :  { %p3879_p10 = scmp.ne.s32.totalorder %s3012_s7, %s3878_s22  ;;  %p3883_p11 = scmp.lt.s32.totalorder %s3012_s7, %s3012_s7 }
 0x3da   :  { %2734 = vmatpush1.bf16.msra.mxu0 %v3724_v1  ;;  %2857 = vmatpush1.bf16.msra.mxu1 %v3727_v2  ;;  %v1827_v1 = vrot.slane %v1814_v59, %v1826_v57  ;;  %v1823_v2 = vrot.slane %v1814_v59, %v1822_v60  ;;  %p3884_p12 = scmp.lt.s32.totalorder %s3882_s23, %s3878_s22 }
 0x3db   :  { %2735 = vmatprep.subr.bf16.mxu0 %v3732_v6  ;;  %2858 = vmatprep.subr.bf16.mxu1 %v3735_v5  ;;  %v1831_v6 = vrot.slane %v1814_v59, %v1830_v62 }
 0x3dc   :  { %p3885_p13 = por %p3884_p12, %p3883_p11 }
 0x3de   :  { %2736 = vmatpush1.bf16.msra.mxu0 %v3730_v7  ;;  %2859 = vmatpush1.bf16.msra.mxu1 %v3733_v8  ;;  %p3886_p0 = pnand %p3885_p13, %p3879_p10 }
 0x3df   :  { %2737 = vmatprep.subr.bf16.mxu0 %v3738_v9  ;;  %2860 = vmatprep.subr.bf16.mxu1 %v3741_v43  ;;  %v2927_v9 = vrot.slane %v2922_v0, %v1818_v58 }
 0x3e2   :  { %2738 = vmatpush1.bf16.msra.mxu0 %v3736_v10  ;;  %2861 = vmatpush1.bf16.msra.mxu1 %v3739_v34 }
 0x3e3   :  { %2739 = vmatprep.subr.bf16.mxu0 %v3744_v12  ;;  %2862 = vmatprep.subr.bf16.mxu1 %v3747_v11  ;;  %v2935_v12 = vrot.slane %v2922_v0, %v1826_v57 }
 0x3e6   :  { %2740 = vmatpush1.bf16.msra.mxu0 %v3742_v13  ;;  %2863 = vmatpush1.bf16.msra.mxu1 %v3745_v14  ;;  %v2931_v13 = vrot.slane %v2922_v0, %v1822_v60 }
 0x3e7   :  { %2741 = vmatprep.subr.bf16.mxu0 %v3750_v15  ;;  %2864 = vmatprep.subr.bf16.mxu1 %v3753_v16 }
 0x3ea   :  { %2742 = vmatpush1.bf16.msra.mxu0 %v3748_v56  ;;  %2865 = vmatpush1.bf16.msra.mxu1 %v3751_v17 }
 0x3eb   :  { %2743 = vmatprep.subr.bf16.mxu0 %v3756_v18  ;;  %2866 = vmatprep.subr.bf16.mxu1 %v3759_v55 }
 0x3ee   :  { %2744 = vmatpush1.bf16.msra.mxu0 %v3754_v19  ;;  %2867 = vmatpush1.bf16.msra.mxu1 %v3757_v61  ;;  %v2939_v61 = vrot.slane %v2922_v0, %v1830_v62 }
 0x3ef   :  { %2754 = vmatprep.subr.bf16.mxu0 %v3762_v20  ;;  %2877 = vmatprep.subr.bf16.mxu1 %v3765_v21 }
 0x3f1   :  { %2746 = vmatmul.mubr.bf16.vlgmr.msra.gmra.mrb[12].mxu0 %v1864_v24  ;;  %2869 = vmatmul.mubr.bf16.vlgmr.msra.gmra.mrb[12].mxu1 %v1864_v24 }
 0x3f2   :  { %2755 = vmatpush1.bf16.msra.mxu0 %v3760_v22  ;;  %2878 = vmatpush1.bf16.msra.mxu1 %v3763_v23 }
 0x3f3   :  { %2756 = vmatprep.subr.bf16.mxu0 %v3768_v25  ;;  %2879 = vmatprep.subr.bf16.mxu1 %v3771_v26 }
 0x3f4   :  { %2786 = vmatprep.mubr.bf16.mxu0 %v3924_v40  ;;  %2909 = vmatprep.mubr.bf16.mxu1 %v3924_v40  ;;  %v3787_v40 = vld [vmem:[#allocation8 + $0x488] ss:$16 sps:$4 sm:$0xff]  }
 0x3f6   :  { %2757 = vmatpush1.bf16.msra.mxu0 %v3766_v27  ;;  %2880 = vmatpush1.bf16.msra.mxu1 %v3769_v3 }
 0x3f7   :  { %2758 = vmatprep.subr.bf16.mxu0 %v3774_v29  ;;  %2881 = vmatprep.subr.bf16.mxu1 %v3777_v30 }
 0x3fa   :  { %2759 = vmatpush1.bf16.msra.mxu0 %v3772_v45  ;;  %2882 = vmatpush1.bf16.msra.mxu1 %v3775_v31  ;;  %v3317_v45 = vld [vmem:[#allocation2] ss:$0 sm:$0xff] }
 0x3fb   :  { %2760 = vmatprep.subr.bf16.mxu0 %v3780_v32  ;;  %2883 = vmatprep.subr.bf16.mxu1 %v3783_v33 }
 0x3fe   :  { %2761 = vmatpush1.bf16.msra.mxu0 %v3778_v35  ;;  %2884 = vmatpush1.bf16.msra.mxu1 %v3781_v36 }
 0x3ff   :  { %2762 = vmatprep.subr.bf16.mxu0 %v3786_v37  ;;  %2885 = vmatprep.subr.bf16.mxu1 %v3789_v38 }
 0x402   :  { %2763 = vmatpush1.bf16.msra.mxu0 %v3784_v39  ;;  %2886 = vmatpush1.bf16.msra.mxu1 %v3787_v40 }
 0x403   :  { %2764 = vmatprep.subr.bf16.mxu0 %v3792_v41  ;;  %2887 = vmatprep.subr.bf16.mxu1 %v3795_v42 }
 0x406   :  { %2765 = vmatpush1.bf16.msra.mxu0 %v3790_v28  ;;  %2888 = vmatpush1.bf16.msra.mxu1 %v3793_v44 }
 0x407   :  { %2766 = vmatprep.subr.bf16.mxu0 %v3798_v46  ;;  %2889 = vmatprep.subr.bf16.mxu1 %v3801_v47 }
 0x40a   :  { %2767 = vmatpush1.bf16.msra.mxu0 %v3796_v48  ;;  %2890 = vmatpush1.bf16.msra.mxu1 %v3799_v49 }
 0x40b   :  { %2768 = vmatprep.subr.bf16.mxu0 %v3804_v50  ;;  %2891 = vmatprep.subr.bf16.mxu1 %v3807_v51 }
 0x40e   :  { %2769 = vmatpush1.bf16.msra.mxu0 %v3802_v52  ;;  %2892 = vmatpush1.bf16.msra.mxu1 %v3805_v53 }
 0x411   :  { %2787 = vmatmul.mubr.bf16.vlgmr.msra.gmra.mrb[12].mxu0 %v1866_v54  ;;  %2910 = vmatmul.mubr.bf16.vlgmr.msra.gmra.mrb[12].mxu1 %v1866_v54 }
 0x4e4   :  { %v2788_v5 = vpop.f32.mrb[12].mxu0  ;;  %v2911_v7 = vpop.f32.mrb[12].mxu1 }
 0x4e5   :  { %v3341_v8 = vadd.f32 %v2788_v5, %v1819_v63  ;;  %v3343_v43 = vadd.f32 %v2911_v7, %v1827_v1  ;;  %v2790_v10 = vpop.f32.mrb[13].mxu0  ;;  %v2913_v34 = vpop.f32.mrb[13].mxu1 }
 0x4e6   :  { %v3342_v11 = vadd.f32 %v2790_v10, %v1823_v2  ;;  %v3344_v14 = vadd.f32 %v2913_v34, %v1831_v6  ;;  %v2792_v4 = vpop.f32.mrb[14].mxu0  ;;  %v2915_v15 = vpop.f32.mrb[14].mxu1 }
 0x4e7   :  { %v2918_v16 = vmax.f32 %v3341_v8, 0.0  ;;  %v2920_v56 = vmax.f32 %v3343_v43, 0.0  ;;  %v2793_v17 = vpop.f32.mrb[15].mxu0  ;;  %v2916_v18 = vpop.f32.mrb[15].mxu1 }
 0x4e8   :  { %v2919_v55 = vmax.f32 %v3342_v11, 0.0  ;;  %v2921_v19 = vmax.f32 %v3344_v14, 0.0 }
 0x4e9   :  { %v2944_v20 = vmul.f32 %v2927_v9, %v2918_v16  ;;  %v2946_v21 = vmul.f32 %v2935_v12, %v2920_v56 }
 0x4ea   :  { %v2945_v22 = vmul.f32 %v2931_v13, %v2919_v55  ;;  %v2947_v25 = vmul.f32 %v2939_v61, %v2921_v19 }
 0x4eb   :  { %v2948_v23 = vsel %vm265_vm4, %v2944_v20, 0.0  ;;  %v2951_v27 = vsel %vm265_vm4, %v2946_v21, 0.0 }
 0x4ec   :  { %v2949_v24 = vsel %vm265_vm4, %v2945_v22, 0.0  ;;  %v2953_v29 = vsel %vm265_vm4, %v2947_v25, 0.0 }
 0x4ed   :  { %v2950_v26 = vadd.f32 %v2949_v24, %v2948_v23 }
 0x4ef   :  { %v2952_v3 = vadd.f32 %v2951_v27, %v2950_v26 }
 0x4f1   :  { %v2954_v30 = vadd.f32 %v2953_v29, %v2952_v3 }
 0x4f3   :  { %2955 = vadd.xlane.f32.xlu1 %v2954_v30 }
 0x580   :  { %v2956_v31 = vpop.xlane.xlu1 %2955 }
 0x581   :  { %v2964_v32 = vadd.f32 %v3317_v45, %v2956_v31 }
 0x583   :  { %v3318_v33 = vmul.f32 -1.442695, %v2964_v32 }
 0x585   :  { %3808 = vpow2.f32 %v3318_v33 }
 0x58f   :  { %v3809_v35 = vpop.eup %3808 }
 0x590   :  { %v2968_v36 = vadd.f32 1.0, %v3809_v35 }
 0x592   :  { %3810 = vrcp.f32 %v2968_v36 }
 0x59c   :  { %v3811_v37 = vpop.eup %3810 }
 0x59d   :  { %2971 = vxpose.xlu0.b32.start.end [1/1] (short) (narrow) %v3811_v37, 8 }
 0x61d   :  { %v2987_v38 = vpop.trf.xlu0 }
 0x61e   :  { %3004 = vst.msk [vmem:[#allocation9] sm:$0x1] %vm3003_vm3, %v2987_v38 }
 0x61f   :  { %3889 = shalt.err (!%p3886_p0)
}
 0x620   :  { %s3890_s24 = scalar_lea.hbm %s4326_s9, 16 }
 0x621   :  { %p3891_p1 = scmp.ne.s32.totalorder %s4326_s9, %s3890_s24  ;;  %p3894_p2 = scmp.lt.u32.totalorder %s3890_s24, %s4326_s9 }
 0x623   :  { %p3896_p3 = pnand %p3894_p2, %p3891_p1 }
 0x625   :  { %3899 = shalt.err (!%p3896_p3)
}
 0x626   :  { %3014 = dma.vmem_to_hbm [thread:$0]  %s3012_s7, 16, %s4326_s9, [#allocation5]  }
 0x627   :  { %3904 = dma.done.wait [#allocation5], 16  }
 0x628   :  { %3905 = vsyncadd [#allocation5], 4294967280 }
 0x629   :  { %3018 = vsyncpa [#allocation4], 1 }
 0x62a   :  { %3019 = vsyncpa [#allocation7], 1 }
 0x62b   :  { %3020 = vsyncpa [#allocation5], 1 }

</bundles_post_ra>
